<compile_context>
chip_gen: v6e
topology: v6e:2x2x1
jax: 0.10.0
libtpu: 0.0.40
codegen_flags: <defaults>
</compile_context>

<pallas_src>
import jax
import jax.numpy as jnp
import numpy as np
from jax.experimental import pallas as pl
from jax.experimental.pallas import tpu as pltpu


def _round_up(x, m):
    return ((x + m - 1) // m) * m


def _pad_axis(a, axis, new_size):
    pad = new_size - a.shape[axis]
    if pad == 0:
        return a
    widths = [(0, 0)] * a.ndim
    widths[axis] = (0, pad)
    return jnp.pad(a, widths)


def sign_kernel(x_ref, wt_ref, bt_ref, wo_ref, bo_ref, out_ref, z_ref):
    """One row-tile grid step (all hops fused in-body).

    x_ref : (R, TN, F)   bf16  all hops' features for this row tile (unpadded F)
    wt_ref: (R, F, Hp)   bf16  theta weights (VMEM-resident)
    bt_ref: (R, 1, Hp)   f32   theta biases  (VMEM-resident)
    wo_ref: (R*Hp, Op)   bf16  omega weight, hop blocks stacked along K
    bo_ref: (1, Op)      f32   omega bias
    out_ref:(TN, Op)     f32   output tile
    z_ref : (TN, R*Hp)   bf16  VMEM scratch: concatenated hidden Z
    """
    R = x_ref.shape[0]
    Hp = bt_ref.shape[-1]

    # Hop loop, fused in-body (R is small & static). Hop r+1's theta matmul
    # (MXU) overlaps hop r's bias + ReLU + bf16 cast (VPU).
    for r in range(R):
        h = jnp.dot(x_ref[r], wt_ref[r], preferred_element_type=jnp.float32)
        z = jnp.maximum(h + bt_ref[r], 0.0)
        z_ref[:, r * Hp:(r + 1) * Hp] = z.astype(jnp.bfloat16)

    # Single omega projection with K = R*Hp; bias folded into the store.
    out_ref[...] = (
        jnp.dot(z_ref[...], wo_ref[...], preferred_element_type=jnp.float32)
        + bo_ref[...]
    )


def sign_forward(x_stack, wt, bt, wo, bo, *, tile_n=512):
    """SIGN forward.

    x_stack: [R, N, F] (bf16 preferred - avoids the wrapper-side cast pass)
    wt: [R, F, H]; bt: [R, 1, H]; wo: [R, H, O]; bo: [1, O]
    Returns f32 [N, O].
    """
    R, N, F = x_stack.shape
    H = wt.shape[-1]
    O = wo.shape[-1]

    # Lane padding only on the hidden/output dims (MXU RHS / store side).
    # The streamed X keeps its native feature width F.
    Hp = _round_up(H, 128)
    Op = _round_up(O, 128)

    # ---- Row tile selection, sized against the real device VMEM ------------
    TN = min(_round_up(N, 8), _round_up(tile_n, 8))

    try:
        vmem_cap = int(pltpu.get_tpu_info().vmem_capacity_bytes)
    except Exception:
        vmem_cap = 64 * 1024 * 1024  # v7x per-core capacity; safe lower bound
    vmem_budget = int(0.85 * vmem_cap)

    def _vmem_bytes(tn):
        # Conservative: weights counted double-buffered even though we request
        # single buffering; includes f32 h/z intermediates and the Z scratch.
        return (
            2 * R * tn * F * 2        # streamed X block (bf16, double-buffered)
            + 2 * R * F * Hp * 2      # theta weights
            + 2 * R * Hp * 4          # theta biases
            + 2 * R * Hp * Op * 2     # omega weight blocks
            + 2 * Op * 4              # omega bias
            + 2 * tn * Op * 4         # f32 output tile (double-buffered)
            + tn * R * Hp * 2         # bf16 Z scratch
            + 2 * tn * Hp * 4         # live f32 h/z intermediates per hop
        )

    while TN > 64 and _vmem_bytes(TN) > vmem_budget:
        TN //= 2
    TN = max(8, _round_up(TN, 8))

    # Prefer an even number of row tiles so the "parallel" axis shards across
    # both v7x TensorCores; harmless on v5e/v6e.
    n_tiles = pl.cdiv(N, TN)
    if n_tiles > 1 and n_tiles % 2 == 1:
        TN = _round_up(pl.cdiv(N, n_tiles + 1), 8)
    Np = _round_up(N, TN)

    vmem_limit = int(min(vmem_budget, max(32 * 1024 * 1024, 2 * _vmem_bytes(TN))))

    # ---- Operand preparation ------------------------------------------------
    # X: cast only if needed (produce bf16 upstream to skip this pass); pad
    # rows only for the final partial tile. No feature-dim padding for X.
    xb = x_stack if x_stack.dtype == jnp.bfloat16 else x_stack.astype(jnp.bfloat16)
    xb = _pad_axis(xb, 1, Np)
    wtb = _pad_axis(wt, 2, Hp).astype(jnp.bfloat16)
    btf = _pad_axis(bt, 2, Hp).astype(jnp.float32)
    # Omega weight: pad each hop block to (Hp, Op), then stack along K so row
    # block r of wob matches Z columns [r*Hp, (r+1)*Hp). Exact (zero padding).
    wob = _pad_axis(_pad_axis(wo, 1, Hp), 2, Op).astype(jnp.bfloat16).reshape(R * Hp, Op)
    bof = _pad_axis(bo, 1, Op).astype(jnp.float32)

    def _run(single_buffer_weights):
        resident = {}
        if single_buffer_weights:
            # Constant-index weights only need one buffer (halves their VMEM).
            resident = dict(pipeline_mode=pl.Buffered(1))
        in_specs = [
            # All hops for the current row tile; F unpadded (block == full dim).
            pl.BlockSpec((R, TN, F), lambda n: (0, n, 0)),
            # Constant-index weights/biases: DMA'd once, VMEM-resident.
            pl.BlockSpec((R, F, Hp), lambda n: (0, 0, 0), **resident),
            pl.BlockSpec((R, 1, Hp), lambda n: (0, 0, 0), **resident),
            pl.BlockSpec((R * Hp, Op), lambda n: (0, 0), **resident),
            pl.BlockSpec((1, Op), lambda n: (0, 0), **resident),
        ]
        return pl.pallas_call(
            sign_kernel,
            out_shape=jax.ShapeDtypeStruct((Np, Op), jnp.float32),
            grid_spec=pltpu.PrefetchScalarGridSpec(
                num_scalar_prefetch=0,
                grid=(Np // TN,),  # rows only; hop reduction is fused in-body
                in_specs=in_specs,
                out_specs=pl.BlockSpec((TN, Op), lambda n: (n, 0)),
                scratch_shapes=[pltpu.VMEM((TN, R * Hp), jnp.bfloat16)],
            ),
            compiler_params=pltpu.CompilerParams(
                dimension_semantics=("parallel",),
                vmem_limit_bytes=vmem_limit,
            ),
        )(xb, wtb, btf, wob, bof)

    try:
        out_padded = _run(single_buffer_weights=hasattr(pl, "Buffered"))
    except Exception:
        # Fallback for runtimes that reject single-buffered pipeline_mode on
        # the resident weights; default double buffering is always valid.
        out_padded = _run(single_buffer_weights=False)

    return out_padded[:N, :O]


def sign_reference(x_stack, wt, bt, wo, bo):
    """Pure-JAX (f32) reference mirroring the PyTorch module."""
    R = x_stack.shape[0]
    results = [x_stack[i] @ wt[i] + bt[i] for i in range(R)]
    Z = jax.nn.relu(jnp.concatenate(results, axis=1))
    W_omega = jnp.concatenate([wo[i] for i in range(R)], axis=0)
    return Z @ W_omega + bo


if __name__ == "__main__":
    # Small shapes consistent with the module: r=2 hops -> 3 projections.
    # N=192 with tile_n=128 exercises row tiling, megacore-even tiles and the
    # partial-last-tile row padding path.
    r = 2
    R = r + 1
    N = 192
    in_size = 48
    hidden = 64
    out_size = 16

    key = jax.random.PRNGKey(0)
    kx, kwt, kbt, kwo, kbo = jax.random.split(key, 5)

    # X is produced directly in bf16 "upstream" so the wrapper does no extra
    # cast pass over the dominant tensor.
    x_stack = jax.random.normal(kx, (R, N, in_size), dtype=jnp.float32).astype(jnp.bfloat16)
    wt = jax.random.normal(kwt, (R, in_size, hidden), dtype=jnp.float32) * 0.1
    bt = jax.random.normal(kbt, (R, 1, hidden), dtype=jnp.float32) * 0.1
    wo = jax.random.normal(kwo, (R, hidden, out_size), dtype=jnp.float32) * 0.1
    bo = jax.random.normal(kbo, (1, out_size), dtype=jnp.float32) * 0.1

    out = sign_forward(x_stack, wt, bt, wo, bo, tile_n=128)
    out = jax.block_until_ready(out)

    ref = sign_reference(x_stack.astype(jnp.float32), wt, bt, wo, bo)
    # bf16 MXU operands with f32 accumulation -> compare at bf16 tolerance.
    np.testing.assert_allclose(np.asarray(out), np.asarray(ref),
                               rtol=2e-2, atol=2e-2)

    print("KERNEL_OK")
</pallas_src>

<mosaic_0001>
module attributes {stable_mosaic.version = 11 : i64} {
  func.func @sign_kernel(%arg0: i32, %arg1: memref<3x128x48xbf16, #tpu.memory_space<vmem>>, %arg2: memref<3x48x128xbf16, #tpu.memory_space<vmem>>, %arg3: memref<3x1x128xf32, #tpu.memory_space<vmem>>, %arg4: memref<384x128xbf16, #tpu.memory_space<vmem>>, %arg5: memref<1x128xf32, #tpu.memory_space<vmem>>, %arg6: memref<128x128xf32, #tpu.memory_space<vmem>>, %arg7: memref<128x384xbf16, #tpu.memory_space<vmem>>) attributes {dimension_semantics = [#tpu.dimension_semantics<parallel>], iteration_bounds = array<i64: 2>, scalar_prefetch = 0 : i64, scratch_operands = 1 : i64, tpu.core_type = #tpu.core_type<tc>, window_params = [{transform_indices = @transform_0, window_bounds = array<i64: 3, 128, 48>}, {pipeline_mode = #tpu.pipeline_mode<synchronous>, transform_indices = @transform_1, window_bounds = array<i64: 3, 48, 128>}, {pipeline_mode = #tpu.pipeline_mode<synchronous>, transform_indices = @transform_2, window_bounds = array<i64: 3, 1, 128>}, {pipeline_mode = #tpu.pipeline_mode<synchronous>, transform_indices = @transform_3, window_bounds = array<i64: 384, 128>}, {pipeline_mode = #tpu.pipeline_mode<synchronous>, transform_indices = @transform_4, window_bounds = array<i64: 1, 128>}, {transform_indices = @transform_5, window_bounds = array<i64: 128, 128>}]} {
    %c0 = arith.constant 0 : index
    %c0_0 = arith.constant 0 : index
    %c0_1 = arith.constant 0 : index
    %0 = vector.load %arg1[%c0, %c0_0, %c0_1] : memref<3x128x48xbf16, #tpu.memory_space<vmem>>, vector<1x128x48xbf16>
    %1 = vector.shape_cast %0 : vector<1x128x48xbf16> to vector<128x48xbf16>
    %c0_2 = arith.constant 0 : index
    %c0_3 = arith.constant 0 : index
    %c0_4 = arith.constant 0 : index
    %2 = vector.load %arg2[%c0_2, %c0_3, %c0_4] : memref<3x48x128xbf16, #tpu.memory_space<vmem>>, vector<1x48x128xbf16>
    %3 = vector.shape_cast %2 : vector<1x48x128xbf16> to vector<48x128xbf16>
    %cst = arith.constant dense<0.000000e+00> : vector<128x128xf32>
    %4 = tpu.matmul %1, %3, %cst {dimension_numbers = #tpu.dot_dimension_numbers<[1], [0], [0], [1], [0, 0, 1, 1], [], []>} : vector<128x48xbf16>, vector<48x128xbf16>, vector<128x128xf32> -> vector<128x128xf32>
    %c0_5 = arith.constant 0 : index
    %c0_6 = arith.constant 0 : index
    %c0_7 = arith.constant 0 : index
    %5 = vector.load %arg3[%c0_5, %c0_6, %c0_7] : memref<3x1x128xf32, #tpu.memory_space<vmem>>, vector<1x1x128xf32>
    %6 = vector.shape_cast %5 : vector<1x1x128xf32> to vector<1x128xf32>
    %7 = vector.broadcast %6 : vector<1x128xf32> to vector<128x128xf32>
    %8 = arith.addf %4, %7 : vector<128x128xf32>
    %cst_8 = arith.constant 0.000000e+00 : f32
    %9 = vector.broadcast %cst_8 : f32 to vector<128x128xf32>
    %10 = arith.maximumf %8, %9 : vector<128x128xf32>
    %11 = arith.truncf %10 : vector<128x128xf32> to vector<128x128xbf16>
    %c0_9 = arith.constant 0 : index
    %c0_10 = arith.constant 0 : index
    %12 = vector.load %arg7[%c0_9, %c0_10] : memref<128x384xbf16, #tpu.memory_space<vmem>>, vector<128x128xbf16>
    tpu.vector_store %arg7[%c0_9, %c0_10], %11 {strides = array<i32>} : memref<128x384xbf16, #tpu.memory_space<vmem>>, vector<128x128xbf16>,
    %c1 = arith.constant 1 : index
    %c0_11 = arith.constant 0 : index
    %c0_12 = arith.constant 0 : index
    %13 = vector.load %arg1[%c1, %c0_11, %c0_12] : memref<3x128x48xbf16, #tpu.memory_space<vmem>>, vector<1x128x48xbf16>
    %14 = vector.shape_cast %13 : vector<1x128x48xbf16> to vector<128x48xbf16>
    %c1_13 = arith.constant 1 : index
    %c0_14 = arith.constant 0 : index
    %c0_15 = arith.constant 0 : index
    %15 = vector.load %arg2[%c1_13, %c0_14, %c0_15] : memref<3x48x128xbf16, #tpu.memory_space<vmem>>, vector<1x48x128xbf16>
    %16 = vector.shape_cast %15 : vector<1x48x128xbf16> to vector<48x128xbf16>
    %cst_16 = arith.constant dense<0.000000e+00> : vector<128x128xf32>
    %17 = tpu.matmul %14, %16, %cst_16 {dimension_numbers = #tpu.dot_dimension_numbers<[1], [0], [0], [1], [0, 0, 1, 1], [], []>} : vector<128x48xbf16>, vector<48x128xbf16>, vector<128x128xf32> -> vector<128x128xf32>
    %c1_17 = arith.constant 1 : index
    %c0_18 = arith.constant 0 : index
    %c0_19 = arith.constant 0 : index
    %18 = vector.load %arg3[%c1_17, %c0_18, %c0_19] : memref<3x1x128xf32, #tpu.memory_space<vmem>>, vector<1x1x128xf32>
    %19 = vector.shape_cast %18 : vector<1x1x128xf32> to vector<1x128xf32>
    %20 = vector.broadcast %19 : vector<1x128xf32> to vector<128x128xf32>
    %21 = arith.addf %17, %20 : vector<128x128xf32>
    %cst_20 = arith.constant 0.000000e+00 : f32
    %22 = vector.broadcast %cst_20 : f32 to vector<128x128xf32>
    %23 = arith.maximumf %21, %22 : vector<128x128xf32>
    %24 = arith.truncf %23 : vector<128x128xf32> to vector<128x128xbf16>
    %c0_21 = arith.constant 0 : index
    %c128 = arith.constant 128 : index
    %25 = vector.load %arg7[%c0_21, %c128] : memref<128x384xbf16, #tpu.memory_space<vmem>>, vector<128x128xbf16>
    tpu.vector_store %arg7[%c0_21, %c128], %24 {strides = array<i32>} : memref<128x384xbf16, #tpu.memory_space<vmem>>, vector<128x128xbf16>,
    %c2 = arith.constant 2 : index
    %c0_22 = arith.constant 0 : index
    %c0_23 = arith.constant 0 : index
    %26 = vector.load %arg1[%c2, %c0_22, %c0_23] : memref<3x128x48xbf16, #tpu.memory_space<vmem>>, vector<1x128x48xbf16>
    %27 = vector.shape_cast %26 : vector<1x128x48xbf16> to vector<128x48xbf16>
    %c2_24 = arith.constant 2 : index
    %c0_25 = arith.constant 0 : index
    %c0_26 = arith.constant 0 : index
    %28 = vector.load %arg2[%c2_24, %c0_25, %c0_26] : memref<3x48x128xbf16, #tpu.memory_space<vmem>>, vector<1x48x128xbf16>
    %29 = vector.shape_cast %28 : vector<1x48x128xbf16> to vector<48x128xbf16>
    %cst_27 = arith.constant dense<0.000000e+00> : vector<128x128xf32>
    %30 = tpu.matmul %27, %29, %cst_27 {dimension_numbers = #tpu.dot_dimension_numbers<[1], [0], [0], [1], [0, 0, 1, 1], [], []>} : vector<128x48xbf16>, vector<48x128xbf16>, vector<128x128xf32> -> vector<128x128xf32>
    %c2_28 = arith.constant 2 : index
    %c0_29 = arith.constant 0 : index
    %c0_30 = arith.constant 0 : index
    %31 = vector.load %arg3[%c2_28, %c0_29, %c0_30] : memref<3x1x128xf32, #tpu.memory_space<vmem>>, vector<1x1x128xf32>
    %32 = vector.shape_cast %31 : vector<1x1x128xf32> to vector<1x128xf32>
    %33 = vector.broadcast %32 : vector<1x128xf32> to vector<128x128xf32>
    %34 = arith.addf %30, %33 : vector<128x128xf32>
    %cst_31 = arith.constant 0.000000e+00 : f32
    %35 = vector.broadcast %cst_31 : f32 to vector<128x128xf32>
    %36 = arith.maximumf %34, %35 : vector<128x128xf32>
    %37 = arith.truncf %36 : vector<128x128xf32> to vector<128x128xbf16>
    %c0_32 = arith.constant 0 : index
    %c256 = arith.constant 256 : index
    %38 = vector.load %arg7[%c0_32, %c256] : memref<128x384xbf16, #tpu.memory_space<vmem>>, vector<128x128xbf16>
    tpu.vector_store %arg7[%c0_32, %c256], %37 {strides = array<i32>} : memref<128x384xbf16, #tpu.memory_space<vmem>>, vector<128x128xbf16>,
    %c0_33 = arith.constant 0 : index
    %c0_34 = arith.constant 0 : index
    %39 = vector.load %arg7[%c0_33, %c0_34] : memref<128x384xbf16, #tpu.memory_space<vmem>>, vector<128x384xbf16>
    %c0_35 = arith.constant 0 : index
    %c0_36 = arith.constant 0 : index
    %40 = vector.load %arg4[%c0_35, %c0_36] : memref<384x128xbf16, #tpu.memory_space<vmem>>, vector<384x128xbf16>
    %cst_37 = arith.constant dense<0.000000e+00> : vector<128x128xf32>
    %41 = tpu.matmul %39, %40, %cst_37 {dimension_numbers = #tpu.dot_dimension_numbers<[1], [0], [0], [1], [0, 0, 1, 1], [], []>} : vector<128x384xbf16>, vector<384x128xbf16>, vector<128x128xf32> -> vector<128x128xf32>
    %c0_38 = arith.constant 0 : index
    %c0_39 = arith.constant 0 : index
    %42 = vector.load %arg5[%c0_38, %c0_39] : memref<1x128xf32, #tpu.memory_space<vmem>>, vector<1x128xf32>
    %43 = vector.broadcast %42 : vector<1x128xf32> to vector<128x128xf32>
    %44 = arith.addf %41, %43 : vector<128x128xf32>
    %c0_40 = arith.constant 0 : index
    %c0_41 = arith.constant 0 : index
    %45 = vector.load %arg6[%c0_40, %c0_41] : memref<128x128xf32, #tpu.memory_space<vmem>>, vector<128x128xf32>
    tpu.vector_store %arg6[%c0_40, %c0_41], %44 {strides = array<i32>} : memref<128x128xf32, #tpu.memory_space<vmem>>, vector<128x128xf32>,
    return
  }
  func.func @transform_0(%arg0: i32) -> (i32, i32, i32) {
    %c0_i32 = arith.constant 0 : i32
    %c0_i32_0 = arith.constant 0 : i32
    %c0_i32_1 = arith.constant 0 : i32
    return %c0_i32, %arg0, %c0_i32_0 : i32, i32, i32
  }
  func.func @transform_1(%arg0: i32) -> (i32, i32, i32) {
    %c0_i32 = arith.constant 0 : i32
    %c0_i32_0 = arith.constant 0 : i32
    %c0_i32_1 = arith.constant 0 : i32
    %c0_i32_2 = arith.constant 0 : i32
    return %c0_i32, %c0_i32_0, %c0_i32_1 : i32, i32, i32
  }
  func.func @transform_2(%arg0: i32) -> (i32, i32, i32) {
    %c0_i32 = arith.constant 0 : i32
    %c0_i32_0 = arith.constant 0 : i32
    %c0_i32_1 = arith.constant 0 : i32
    %c0_i32_2 = arith.constant 0 : i32
    return %c0_i32, %c0_i32_0, %c0_i32_1 : i32, i32, i32
  }
  func.func @transform_3(%arg0: i32) -> (i32, i32) {
    %c0_i32 = arith.constant 0 : i32
    %c0_i32_0 = arith.constant 0 : i32
    %c0_i32_1 = arith.constant 0 : i32
    return %c0_i32, %c0_i32_0 : i32, i32
  }
  func.func @transform_4(%arg0: i32) -> (i32, i32) {
    %c0_i32 = arith.constant 0 : i32
    %c0_i32_0 = arith.constant 0 : i32
    %c0_i32_1 = arith.constant 0 : i32
    return %c0_i32, %c0_i32_0 : i32, i32
  }
  func.func @transform_5(%arg0: i32) -> (i32, i32) {
    %c0_i32 = arith.constant 0 : i32
    %c0_i32_0 = arith.constant 0 : i32
    return %arg0, %c0_i32 : i32, i32
  }
}

module attributes {stable_mosaic.version = 11 : i64} {
  func.func @sign_kernel(%arg0: i32, %arg1: memref<3x128x48xbf16, #tpu.memory_space<vmem>>, %arg2: memref<3x48x128xbf16, #tpu.memory_space<vmem>>, %arg3: memref<3x1x128xf32, #tpu.memory_space<vmem>>, %arg4: memref<384x128xbf16, #tpu.memory_space<vmem>>, %arg5: memref<1x128xf32, #tpu.memory_space<vmem>>, %arg6: memref<128x128xf32, #tpu.memory_space<vmem>>, %arg7: memref<128x384xbf16, #tpu.memory_space<vmem>>) attributes {dimension_semantics = [#tpu.dimension_semantics<parallel>], iteration_bounds = array<i64: 2>, scalar_prefetch = 0 : i64, scratch_operands = 1 : i64, tpu.core_type = #tpu.core_type<tc>, window_params = [{transform_indices = @transform_0, window_bounds = array<i64: 3, 128, 48>}, {pipeline_mode = #tpu.pipeline_mode<synchronous>, transform_indices = @transform_1, window_bounds = array<i64: 3, 48, 128>}, {pipeline_mode = #tpu.pipeline_mode<synchronous>, transform_indices = @transform_2, window_bounds = array<i64: 3, 1, 128>}, {pipeline_mode = #tpu.pipeline_mode<synchronous>, transform_indices = @transform_3, window_bounds = array<i64: 384, 128>}, {pipeline_mode = #tpu.pipeline_mode<synchronous>, transform_indices = @transform_4, window_bounds = array<i64: 1, 128>}, {transform_indices = @transform_5, window_bounds = array<i64: 128, 128>}]} {
    %c0 = arith.constant 0 : index
    %c0_0 = arith.constant 0 : index
    %c0_1 = arith.constant 0 : index
    %0 = vector.load %arg1[%c0, %c0_0, %c0_1] : memref<3x128x48xbf16, #tpu.memory_space<vmem>>, vector<1x128x48xbf16>
    %1 = vector.shape_cast %0 : vector<1x128x48xbf16> to vector<128x48xbf16>
    %c0_2 = arith.constant 0 : index
    %c0_3 = arith.constant 0 : index
    %c0_4 = arith.constant 0 : index
    %2 = vector.load %arg2[%c0_2, %c0_3, %c0_4] : memref<3x48x128xbf16, #tpu.memory_space<vmem>>, vector<1x48x128xbf16>
    %3 = vector.shape_cast %2 : vector<1x48x128xbf16> to vector<48x128xbf16>
    %cst = arith.constant dense<0.000000e+00> : vector<128x128xf32>
    %4 = tpu.matmul %1, %3, %cst {dimension_numbers = #tpu.dot_dimension_numbers<[1], [0], [0], [1], [0, 0, 1, 1], [], []>} : vector<128x48xbf16>, vector<48x128xbf16>, vector<128x128xf32> -> vector<128x128xf32>
    %c0_5 = arith.constant 0 : index
    %c0_6 = arith.constant 0 : index
    %c0_7 = arith.constant 0 : index
    %5 = vector.load %arg3[%c0_5, %c0_6, %c0_7] : memref<3x1x128xf32, #tpu.memory_space<vmem>>, vector<1x1x128xf32>
    %6 = vector.shape_cast %5 : vector<1x1x128xf32> to vector<1x128xf32>
    %7 = vector.broadcast %6 : vector<1x128xf32> to vector<128x128xf32>
    %8 = arith.addf %4, %7 : vector<128x128xf32>
    %cst_8 = arith.constant 0.000000e+00 : f32
    %9 = vector.broadcast %cst_8 : f32 to vector<128x128xf32>
    %10 = arith.maximumf %8, %9 : vector<128x128xf32>
    %11 = arith.truncf %10 : vector<128x128xf32> to vector<128x128xbf16>
    %c0_9 = arith.constant 0 : index
    %c0_10 = arith.constant 0 : index
    %12 = vector.load %arg7[%c0_9, %c0_10] : memref<128x384xbf16, #tpu.memory_space<vmem>>, vector<128x128xbf16>
    tpu.vector_store %arg7[%c0_9, %c0_10], %11 {strides = array<i32>} : memref<128x384xbf16, #tpu.memory_space<vmem>>, vector<128x128xbf16>,
    %c1 = arith.constant 1 : index
    %c0_11 = arith.constant 0 : index
    %c0_12 = arith.constant 0 : index
    %13 = vector.load %arg1[%c1, %c0_11, %c0_12] : memref<3x128x48xbf16, #tpu.memory_space<vmem>>, vector<1x128x48xbf16>
    %14 = vector.shape_cast %13 : vector<1x128x48xbf16> to vector<128x48xbf16>
    %c1_13 = arith.constant 1 : index
    %c0_14 = arith.constant 0 : index
    %c0_15 = arith.constant 0 : index
    %15 = vector.load %arg2[%c1_13, %c0_14, %c0_15] : memref<3x48x128xbf16, #tpu.memory_space<vmem>>, vector<1x48x128xbf16>
    %16 = vector.shape_cast %15 : vector<1x48x128xbf16> to vector<48x128xbf16>
    %cst_16 = arith.constant dense<0.000000e+00> : vector<128x128xf32>
    %17 = tpu.matmul %14, %16, %cst_16 {dimension_numbers = #tpu.dot_dimension_numbers<[1], [0], [0], [1], [0, 0, 1, 1], [], []>} : vector<128x48xbf16>, vector<48x128xbf16>, vector<128x128xf32> -> vector<128x128xf32>
    %c1_17 = arith.constant 1 : index
    %c0_18 = arith.constant 0 : index
    %c0_19 = arith.constant 0 : index
    %18 = vector.load %arg3[%c1_17, %c0_18, %c0_19] : memref<3x1x128xf32, #tpu.memory_space<vmem>>, vector<1x1x128xf32>
    %19 = vector.shape_cast %18 : vector<1x1x128xf32> to vector<1x128xf32>
    %20 = vector.broadcast %19 : vector<1x128xf32> to vector<128x128xf32>
    %21 = arith.addf %17, %20 : vector<128x128xf32>
    %cst_20 = arith.constant 0.000000e+00 : f32
    %22 = vector.broadcast %cst_20 : f32 to vector<128x128xf32>
    %23 = arith.maximumf %21, %22 : vector<128x128xf32>
    %24 = arith.truncf %23 : vector<128x128xf32> to vector<128x128xbf16>
    %c0_21 = arith.constant 0 : index
    %c128 = arith.constant 128 : index
    %25 = vector.load %arg7[%c0_21, %c128] : memref<128x384xbf16, #tpu.memory_space<vmem>>, vector<128x128xbf16>
    tpu.vector_store %arg7[%c0_21, %c128], %24 {strides = array<i32>} : memref<128x384xbf16, #tpu.memory_space<vmem>>, vector<128x128xbf16>,
    %c2 = arith.constant 2 : index
    %c0_22 = arith.constant 0 : index
    %c0_23 = arith.constant 0 : index
    %26 = vector.load %arg1[%c2, %c0_22, %c0_23] : memref<3x128x48xbf16, #tpu.memory_space<vmem>>, vector<1x128x48xbf16>
    %27 = vector.shape_cast %26 : vector<1x128x48xbf16> to vector<128x48xbf16>
    %c2_24 = arith.constant 2 : index
    %c0_25 = arith.constant 0 : index
    %c0_26 = arith.constant 0 : index
    %28 = vector.load %arg2[%c2_24, %c0_25, %c0_26] : memref<3x48x128xbf16, #tpu.memory_space<vmem>>, vector<1x48x128xbf16>
    %29 = vector.shape_cast %28 : vector<1x48x128xbf16> to vector<48x128xbf16>
    %cst_27 = arith.constant dense<0.000000e+00> : vector<128x128xf32>
    %30 = tpu.matmul %27, %29, %cst_27 {dimension_numbers = #tpu.dot_dimension_numbers<[1], [0], [0], [1], [0, 0, 1, 1], [], []>} : vector<128x48xbf16>, vector<48x128xbf16>, vector<128x128xf32> -> vector<128x128xf32>
    %c2_28 = arith.constant 2 : index
    %c0_29 = arith.constant 0 : index
    %c0_30 = arith.constant 0 : index
    %31 = vector.load %arg3[%c2_28, %c0_29, %c0_30] : memref<3x1x128xf32, #tpu.memory_space<vmem>>, vector<1x1x128xf32>
    %32 = vector.shape_cast %31 : vector<1x1x128xf32> to vector<1x128xf32>
    %33 = vector.broadcast %32 : vector<1x128xf32> to vector<128x128xf32>
    %34 = arith.addf %30, %33 : vector<128x128xf32>
    %cst_31 = arith.constant 0.000000e+00 : f32
    %35 = vector.broadcast %cst_31 : f32 to vector<128x128xf32>
    %36 = arith.maximumf %34, %35 : vector<128x128xf32>
    %37 = arith.truncf %36 : vector<128x128xf32> to vector<128x128xbf16>
    %c0_32 = arith.constant 0 : index
    %c256 = arith.constant 256 : index
    %38 = vector.load %arg7[%c0_32, %c256] : memref<128x384xbf16, #tpu.memory_space<vmem>>, vector<128x128xbf16>
    tpu.vector_store %arg7[%c0_32, %c256], %37 {strides = array<i32>} : memref<128x384xbf16, #tpu.memory_space<vmem>>, vector<128x128xbf16>,
    %c0_33 = arith.constant 0 : index
    %c0_34 = arith.constant 0 : index
    %39 = vector.load %arg7[%c0_33, %c0_34] : memref<128x384xbf16, #tpu.memory_space<vmem>>, vector<128x384xbf16>
    %c0_35 = arith.constant 0 : index
    %c0_36 = arith.constant 0 : index
    %40 = vector.load %arg4[%c0_35, %c0_36] : memref<384x128xbf16, #tpu.memory_space<vmem>>, vector<384x128xbf16>
    %cst_37 = arith.constant dense<0.000000e+00> : vector<128x128xf32>
    %41 = tpu.matmul %39, %40, %cst_37 {dimension_numbers = #tpu.dot_dimension_numbers<[1], [0], [0], [1], [0, 0, 1, 1], [], []>} : vector<128x384xbf16>, vector<384x128xbf16>, vector<128x128xf32> -> vector<128x128xf32>
    %c0_38 = arith.constant 0 : index
    %c0_39 = arith.constant 0 : index
    %42 = vector.load %arg5[%c0_38, %c0_39] : memref<1x128xf32, #tpu.memory_space<vmem>>, vector<1x128xf32>
    %43 = vector.broadcast %42 : vector<1x128xf32> to vector<128x128xf32>
    %44 = arith.addf %41, %43 : vector<128x128xf32>
    %c0_40 = arith.constant 0 : index
    %c0_41 = arith.constant 0 : index
    %45 = vector.load %arg6[%c0_40, %c0_41] : memref<128x128xf32, #tpu.memory_space<vmem>>, vector<128x128xf32>
    tpu.vector_store %arg6[%c0_40, %c0_41], %44 {strides = array<i32>} : memref<128x128xf32, #tpu.memory_space<vmem>>, vector<128x128xf32>,
    return
  }
  func.func @transform_0(%arg0: i32) -> (i32, i32, i32) {
    %c0_i32 = arith.constant 0 : i32
    %c0_i32_0 = arith.constant 0 : i32
    %c0_i32_1 = arith.constant 0 : i32
    return %c0_i32, %arg0, %c0_i32_0 : i32, i32, i32
  }
  func.func @transform_1(%arg0: i32) -> (i32, i32, i32) {
    %c0_i32 = arith.constant 0 : i32
    %c0_i32_0 = arith.constant 0 : i32
    %c0_i32_1 = arith.constant 0 : i32
    %c0_i32_2 = arith.constant 0 : i32
    return %c0_i32, %c0_i32_0, %c0_i32_1 : i32, i32, i32
  }
  func.func @transform_2(%arg0: i32) -> (i32, i32, i32) {
    %c0_i32 = arith.constant 0 : i32
    %c0_i32_0 = arith.constant 0 : i32
    %c0_i32_1 = arith.constant 0 : i32
    %c0_i32_2 = arith.constant 0 : i32
    return %c0_i32, %c0_i32_0, %c0_i32_1 : i32, i32, i32
  }
  func.func @transform_3(%arg0: i32) -> (i32, i32) {
    %c0_i32 = arith.constant 0 : i32
    %c0_i32_0 = arith.constant 0 : i32
    %c0_i32_1 = arith.constant 0 : i32
    return %c0_i32, %c0_i32_0 : i32, i32
  }
  func.func @transform_4(%arg0: i32) -> (i32, i32) {
    %c0_i32 = arith.constant 0 : i32
    %c0_i32_0 = arith.constant 0 : i32
    %c0_i32_1 = arith.constant 0 : i32
    return %c0_i32, %c0_i32_0 : i32, i32
  }
  func.func @transform_5(%arg0: i32) -> (i32, i32) {
    %c0_i32 = arith.constant 0 : i32
    %c0_i32_0 = arith.constant 0 : i32
    return %arg0, %c0_i32 : i32, i32
  }
}

</mosaic_0001>

<bundles_post_ra>
// kernel: tpu_custom_call.1
= control target key start
LH: loop header
LB: loop body
LE: loop exit
PB: predicated region body
PF: predicated region fallthrough
CT: control target
= control target key end

     0   :  { %10 = vsyncpa [#allocation5], 0  ;;  %s3143_s0 = inlined_call_operand.vmem [shape: bf16[3,256,48], index: 0, kind: input, shape index: {}]   ;;  %s3144_s1 = inlined_call_operand.vmem [shape: bf16[3,48,128], index: 1, kind: input, shape index: {}]   ;;  %s3145_s2 = inlined_call_operand.vmem [shape: f32[3,1,128], index: 2, kind: input, shape index: {}]   ;;  %s3146_s3 = inlined_call_operand.vmem [shape: bf16[384,128], index: 3, kind: input, shape index: {}]   ;;  %s3147_s4 = inlined_call_operand.vmem [shape: f32[1,128], index: 4, kind: input, shape index: {}]   ;;  %s3148_s5 = inlined_call_operand.hbm [shape: f32[256,128], index: 5, kind: output, shape index: {}]  }
   0x1   :  { %12 = vsyncpa [#allocation5 + $0x1], 0  ;;  %s2728_s18 = smov 0   ;;  %s2730_s19 = smov 0  }
   0x2   :  { %s2732_s20 = smov 0   ;;  %s2734_s21 = smov 0  }
   0x3 LB: > { %s2027_s22 = sadd.s32 4294967295, %s2693_s21   ;;  %s2028_s23 = sadd.s32 4294967294, %s2693_s21   ;;  %s2693_s21 = sphi %s2734_s21, %s3154_s21   ;;  %s2689_s20 = sphi %s2732_s20, %s3153_s20   ;;  %s2685_s19 = sphi %s2730_s19, %s3152_s19   ;;  %s2681_s18 = sphi %s2728_s18, %s3151_s18  }
   0x4   : > { %s2751_s24 = sadd.s32 1, %s2693_s21   ;;  %s25_s25 = sadd.s32 1, %s2689_s20 }
   0x5   : > { %s22_s26 = ssub.s32 %s2693_s21, %s2751_s24  ;;  %p32_p0 = scmp.ne.s32.totalorder %s2689_s20, %s2685_s19 }
   0x6   : > { %p23_p1 = scmp.eq.s32.totalorder %s22_s26, 0  ;;  %p33_p2 = scmp.eq.s32.totalorder %s2693_s21, 0 }
   0x7   : > { %p146_p3 = scmp.eq.s32.totalorder %s2027_s22, 1  ;;  %p151_p4 = scmp.ne.s32.totalorder %s2685_s19, %s2681_s18 }
   0x8   : > { %s2764_s27 = scalar_select %p23_p1, %s2689_s20, %s25_s25  }
   0x9   : > { %p34_p5 = por %p33_p2, %p32_p0  ;;  %p2766_p6 = por %p146_p3, %p32_p0 }
   0xa   : > { %p152_p7 = scmp.eq.s32.totalorder %s2028_s23, 1  ;;  %p2030_p9 = scmp.ge.s32.totalorder %s2693_s21, 2 }
   0xc   : > { %p2770_p8 = por %p152_p7, %p151_p4  ;;  %180 = sbr.rel (%p2030_p9) target bundleno = 34 (0x22), region = 32 }
  0x11   : > { %183 = sbr.rel (!%p34_p5) target bundleno = 34 (0x22), region = 36  ;;  %s185_s30 = sand.u32 (%p34_p5), 1, %s2689_s20  }
  0x12   : > { %s2243_s6 = sshll.u32 (%p34_p5), %s2693_s21, 6  ;;  %s2504_s7 = smul.u32 (%p34_p5), 192, %s185_s30 }
  0x13   : > { %s2782_s10 = scalar_lea.vmem (%p34_p5), %s3143_s0, %s2243_s6 }
  0x14   : > { %v207_v0 = vld [vmem:[%s2782_s10] sm:$0xff] (%p34_p5)   ;;  %v211_v1 = vld [vmem:[%s2782_s10 + $0x8] sm:$0xff] (%p34_p5)   ;;  %v215_v2 = vld [vmem:[%s2782_s10 + $0x10] sm:$0xff] (%p34_p5)   ;;  %s2790_s11 = scalar_lea.vmem (%p34_p5), [#allocation3], %s2504_s7 }
  0x15   : > { %v219_v3 = vld [vmem:[%s2782_s10 + $0x18] sm:$0xff] (%p34_p5)   ;;  %v223_v4 = vld [vmem:[%s2782_s10 + $0x20] sm:$0xff] (%p34_p5)   ;;  %v227_v5 = vld [vmem:[%s2782_s10 + $0x28] sm:$0xff] (%p34_p5)   ;;  %208 = vst [vmem:[%s2790_s11] sm:$0xff] (%p34_p5), %v207_v0  }
  0x16   : > { %212 = vst [vmem:[%s2790_s11 + $0x8] sm:$0xff] %v211_v1   ;;  %216 = vst [vmem:[%s2790_s11 + $0x10] sm:$0xff] %v215_v2   ;;  %v231_v6 = vld [vmem:[%s2782_s10 + $0x30] sm:$0xff]   ;;  %v235_v7 = vld [vmem:[%s2782_s10 + $0x38] sm:$0xff]  }
  0x17   : > { %220 = vst [vmem:[%s2790_s11 + $0x18] sm:$0xff] %v219_v3   ;;  %224 = vst [vmem:[%s2790_s11 + $0x20] sm:$0xff] %v223_v4   ;;  %v239_v8 = vld [vmem:[%s2782_s10 + $0x80] sm:$0xff]   ;;  %v243_v9 = vld [vmem:[%s2782_s10 + $0x88] sm:$0xff]  }
  0x18   : > { %228 = vst [vmem:[%s2790_s11 + $0x28] sm:$0xff] %v227_v5   ;;  %232 = vst [vmem:[%s2790_s11 + $0x30] sm:$0xff] %v231_v6   ;;  %v247_v10 = vld [vmem:[%s2782_s10 + $0x90] sm:$0xff]   ;;  %v251_v11 = vld [vmem:[%s2782_s10 + $0x98] sm:$0xff]  }
  0x19   : > { %236 = vst [vmem:[%s2790_s11 + $0x38] sm:$0xff] %v235_v7   ;;  %240 = vst [vmem:[%s2790_s11 + $0x40] sm:$0xff] %v239_v8   ;;  %v255_v12 = vld [vmem:[%s2782_s10 + $0xa0] sm:$0xff]   ;;  %v259_v13 = vld [vmem:[%s2782_s10 + $0xa8] sm:$0xff]  }
  0x1a   : > { %244 = vst [vmem:[%s2790_s11 + $0x48] sm:$0xff] %v243_v9   ;;  %248 = vst [vmem:[%s2790_s11 + $0x50] sm:$0xff] %v247_v10   ;;  %v263_v14 = vld [vmem:[%s2782_s10 + $0xb0] sm:$0xff]   ;;  %v267_v15 = vld [vmem:[%s2782_s10 + $0xb8] sm:$0xff]  }
  0x1b   : > { %252 = vst [vmem:[%s2790_s11 + $0x58] sm:$0xff] %v251_v11   ;;  %256 = vst [vmem:[%s2790_s11 + $0x60] sm:$0xff] %v255_v12   ;;  %v271_v16 = vld [vmem:[%s2782_s10 + $0x100] sm:$0xff]   ;;  %v275_v17 = vld [vmem:[%s2782_s10 + $0x108] sm:$0xff]  }
  0x1c   : > { %260 = vst [vmem:[%s2790_s11 + $0x68] sm:$0xff] %v259_v13   ;;  %264 = vst [vmem:[%s2790_s11 + $0x70] sm:$0xff] %v263_v14   ;;  %v279_v18 = vld [vmem:[%s2782_s10 + $0x110] sm:$0xff]   ;;  %v283_v19 = vld [vmem:[%s2782_s10 + $0x118] sm:$0xff]  }
  0x1d   : > { %268 = vst [vmem:[%s2790_s11 + $0x78] sm:$0xff] %v267_v15   ;;  %272 = vst [vmem:[%s2790_s11 + $0x80] sm:$0xff] %v271_v16   ;;  %v287_v20 = vld [vmem:[%s2782_s10 + $0x120] sm:$0xff]   ;;  %v291_v21 = vld [vmem:[%s2782_s10 + $0x128] sm:$0xff]  }
  0x1e   : > { %276 = vst [vmem:[%s2790_s11 + $0x88] sm:$0xff] %v275_v17   ;;  %280 = vst [vmem:[%s2790_s11 + $0x90] sm:$0xff] %v279_v18   ;;  %v295_v22 = vld [vmem:[%s2782_s10 + $0x130] sm:$0xff]   ;;  %v299_v23 = vld [vmem:[%s2782_s10 + $0x138] sm:$0xff]  }
  0x1f   : > { %284 = vst [vmem:[%s2790_s11 + $0x98] sm:$0xff] %v283_v19   ;;  %288 = vst [vmem:[%s2790_s11 + $0xa0] sm:$0xff] %v287_v20  }
  0x20   : > { %292 = vst [vmem:[%s2790_s11 + $0xa8] sm:$0xff] %v291_v21   ;;  %296 = vst [vmem:[%s2790_s11 + $0xb0] sm:$0xff] %v295_v22  }
  0x21   : > { %300 = vst [vmem:[%s2790_s11 + $0xb8] sm:$0xff] %v299_v23  }
  0x22 PF: > { %p2033_p10 = scmp.ge.s32.totalorder %s2693_s21, 1  ;;  %p421_p11 = scmp.lt.s32.totalorder %s2693_s21, 3 }
  0x24   : > { %p422_p12 = pnand %p2033_p10, %p421_p11 }
  0x25   : > { %s2840_s14 = sand.u32 (!%p422_p12), 1, %s2685_s19  }
  0x26   : > { %425 = sbr.rel (%p422_p12) target bundleno = 545 (0x221), region = 77  ;;  %s2034_s12 = sshll.u32 (!%p422_p12), %s2840_s14, 7 }
  0x27   : > { %s2505_s17 = smul.u32 (!%p422_p12), 192, %s2840_s14  ;;  %s3060_s16 = scalar_lea.vmem (!%p422_p12), [#allocation4], %s2034_s12 }
  0x28   : > { %s1960_s23 = sshll.u32 (!%p422_p12), %s3060_s16, 4  ;;  %s3099_s23 = int_to_ptr.vmem [resolvable:$true] %s1960_s23 }
  0x29   : > { %s2858_s10 = scalar_lea.vmem (!%p422_p12), [#allocation3], %s2505_s17  ;;  %s2292_s17 = sshll.u32 (!%p422_p12), %s2027_s22, 11 }
  0x2a   : > { %s3097_s30 = scalar_lea.hbm (!%p422_p12), %s3148_s5, %s2292_s17  ;;  %s2633_s6 = scalar_lea.vmem (!%p422_p12), %s3099_s23, 2048 }
  0x2b   : > { %v2547_v24 = vld [vmem:[%s3144_s1 + $0x10] sm:$0xff]   ;;  %v2548_v25 = vld [vmem:[%s3144_s1 + $0x28] sm:$0xff]   ;;  %v2550_v27 = vld [vmem:[%s3144_s1 + $0x20] sm:$0xff]   ;;  %vm545_vm0 = vcmask 392192   ;;  %p2634_p13 = scmp.ne.s32.totalorder %s3099_s23, %s2633_s6  ;;  %s2695_s22 = smov [#allocation4]  }
  0x2c   : > { %2406 = vmatprep.subr.bf16.mxu0 %v2547_v24  ;;  %v2549_v26 = vld [vmem:[%s3144_s1 + $0x8] sm:$0xff]   ;;  %2428 = vmatprep.subr.bf16.mxu1 %v2548_v25  ;;  %v2551_v28 = vld [vmem:[%s3144_s1] sm:$0xff]   ;;  %v2552_v29 = vld [vmem:[%s3144_s1 + $0x18] sm:$0xff]   ;;  %s2637_s7 = sshll.u32 %s2695_s22, 4  ;;  %s2638_s7 = int_to_ptr.vmem [resolvable:$false] %s2637_s7 }
  0x2d   : > { %2407 = vmatpush3.bf16.msra.mxu0 %v2547_v24  ;;  %2429 = vmatpush3.bf16.msra.mxu1 %v2548_v25  ;;  %v2553_v30 = vld [vmem:[%s2858_s10] sm:$0xff]   ;;  %v2555_v32 = vld [vmem:[%s2858_s10 + $0x8] sm:$0xff]   ;;  %v2558_v35 = vld [vmem:[%s2858_s10 + $0x10] sm:$0xff]   ;;  %p2635_p0 = pnand %p2634_p13, %p2766_p6  ;;  %s2639_s8 = scalar_lea.vmem %s2638_s7, 4096 }
  0x2e   : > { %2408 = vmatprep.subr.bf16.mxu0 %v2549_v26  ;;  %2430 = vmatprep.subr.bf16.mxu1 %v2550_v27  ;;  %v2554_v31 = vld [vmem:[%s2858_s10 + $0x40] sm:$0xff]   ;;  %v2556_v33 = vld [vmem:[%s2858_s10 + $0x48] sm:$0xff]   ;;  %v2559_v36 = vld [vmem:[%s2858_s10 + $0x50] sm:$0xff]   ;;  %p2640_p2 = scmp.lt.s32.totalorder %s3099_s23, %s2638_s7  ;;  %p2641_p3 = scmp.lt.s32.totalorder %s2639_s8, %s2633_s6 }
  0x2f   : > { %2412 = vmatprep.mubr.msk.bf16.mxu0 %vm545_vm0, %v2553_v30  ;;  %2434 = vmatprep.mubr.msk.bf16.mxu1 %vm545_vm0, %v2554_v31  ;;  %v2557_v34 = vld [vmem:[%s3144_s1 + $0x40] sm:$0xff]   ;;  %v2562_v37 = vld [vmem:[%s3144_s1 + $0x38] sm:$0xff]   ;;  %v2571_v42 = vld [vmem:[%s3144_s1 + $0x30] sm:$0xff]   ;;  %p2636_p1 = pneg %p2635_p0 }
  0x30   : > { %v2560_v38 = vld [vmem:[%s2858_s10 + $0x18] sm:$0xff]   ;;  %v2563_v40 = vld [vmem:[%s2858_s10 + $0x20] sm:$0xff]   ;;  %v2565_v43 = vld [vmem:[%s2858_s10 + $0x28] sm:$0xff]   ;;  %p2642_p4 = por %p2641_p3, %p2640_p2 }
  0x31   : > { %2409 = vmatpush3.bf16.msra.mxu0 %v2549_v26  ;;  %2431 = vmatpush3.bf16.msra.mxu1 %v2550_v27  ;;  %v2561_v39 = vld [vmem:[%s2858_s10 + $0x58] sm:$0xff]   ;;  %v2564_v41 = vld [vmem:[%s2858_s10 + $0x60] sm:$0xff]   ;;  %v2566_v44 = vld [vmem:[%s2858_s10 + $0x68] sm:$0xff]  }
  0x32   : > { %2410 = vmatprep.subr.bf16.mxu0 %v2551_v28  ;;  %2432 = vmatprep.subr.bf16.mxu1 %v2552_v29  ;;  %v2567_v45 = vld [vmem:[%s2858_s10 + $0x30] sm:$0xff]   ;;  %v2569_v47 = vld [vmem:[%s2858_s10 + $0x38] sm:$0xff]   ;;  %v2572_v49 = vld [vmem:[%s2858_s10 + $0x80] sm:$0xff]   ;;  %p2643_p5 = pnand %p2642_p4, %p2636_p1 }
  0x33   : > { %v2568_v46 = vld [vmem:[%s2858_s10 + $0x70] sm:$0xff]   ;;  %v2570_v48 = vld [vmem:[%s2858_s10 + $0x78] sm:$0xff]   ;;  %v2584_v54 = vld [vmem:[%s3146_s3 + $0x68] sm:$0xff]  }
  0x34   : > { %v2580_v50 = vld [vmem:[%s3146_s3 + $0x78] sm:$0xff]   ;;  %v2582_v52 = vld [vmem:[%s3146_s3 + $0x70] sm:$0xff]   ;;  %v2573_v55 = vld [vmem:[%s2858_s10 + $0x88] sm:$0xff]  }
  0x35   : > { %2411 = vmatpush3.bf16.msra.mxu0 %v2551_v28  ;;  %2433 = vmatpush3.bf16.msra.mxu1 %v2552_v29  ;;  %v2581_v51 = vld [vmem:[%s3146_s3 + $0x38] sm:$0xff]   ;;  %v2583_v53 = vld [vmem:[%s3146_s3 + $0x30] sm:$0xff]   ;;  %v2576_v58 = vld [vmem:[%s2858_s10 + $0xa0] sm:$0xff]  }
  0x36   : > { %2450 = vmatprep.subr.bf16.mxu0 %v2557_v34  ;;  %2326 = vmatprep.subr.bf16.mxu1 %v2580_v50  ;;  %v2574_v56 = vld [vmem:[%s2858_s10 + $0x90] sm:$0xff]   ;;  %v2575_v57 = vld [vmem:[%s2858_s10 + $0x98] sm:$0xff]   ;;  %v2577_v59 = vld [vmem:[%s2858_s10 + $0xa8] sm:$0xff]  }
  0x37   : > { %v2578_v60 = vld [vmem:[%s2858_s10 + $0xb0] sm:$0xff]   ;;  %v2579_v61 = vld [vmem:[%s2858_s10 + $0xb8] sm:$0xff]   ;;  %v2585_v62 = vld [vmem:[%s3146_s3 + $0x28] sm:$0xff]   ;;  %s1947_s10 = scalar_lea.sflag [#allocation5], %s2840_s14 }
  0x38   : > { %2413 = vmatmul.mubr.msk.bf16.vlgmr.msra.gmra.mxu0 %vm545_vm0, %v2555_v32  ;;  %2435 = vmatmul.mubr.msk.bf16.vlgmr.msra.gmra.mxu1 %vm545_vm0, %v2556_v33  ;;  %v2586_v63 = vld [vmem:[%s3146_s3 + $0x60] sm:$0xff]   ;;  %v2588_v1 = vld [vmem:[%s3146_s3 + $0x58] sm:$0xff]   ;;  %v2590_v3 = vld [vmem:[%s3146_s3 + $0x50] sm:$0xff]  }
  0x39   : > { %2451 = vmatpush3.bf16.msra.mxu0 %v2557_v34  ;;  %2416 = vmatprep.mubr.msk.bf16.mxu0 %vm545_vm0, %v2558_v35  ;;  %v2587_v0 = vld [vmem:[%s3146_s3 + $0x20] sm:$0xff]   ;;  %v2589_v2 = vld [vmem:[%s3146_s3 + $0x18] sm:$0xff]   ;;  %v2591_v4 = vld [vmem:[%s3146_s3 + $0x10] sm:$0xff]  }
  0x3a   : > { %2438 = vmatprep.mubr.msk.bf16.mxu1 %vm545_vm0, %v2559_v36  ;;  %2452 = vmatprep.subr.bf16.mxu0 %v2562_v37  ;;  %v2592_v5 = vld [vmem:[%s3146_s3 + $0x48] sm:$0xff]   ;;  %v2594_v7 = vld [vmem:[%s3146_s3 + $0x40] sm:$0xff]   ;;  %v2599_v9 = vld [vmem:[%s3146_s3 + $0xb8] sm:$0xff]  }
  0x3b   : > { %2327 = vmatpush3.bf16.msra.mxu1 %v2581_v51  ;;  %v2593_v6 = vld [vmem:[%s3146_s3 + $0x8] sm:$0xff]   ;;  %v2595_v8 = vld [vmem:[%s3146_s3] sm:$0xff]   ;;  %v2602_v10 = vld [vmem:[%s3146_s3 + $0xb0] sm:$0xff]  }
  0x3c   : > { %2328 = vmatprep.subr.bf16.mxu1 %v2582_v52  ;;  %v2603_v11 = vld [vmem:[%s3146_s3 + $0xa8] sm:$0xff]   ;;  %v2606_v12 = vld [vmem:[%s3146_s3 + $0xa0] sm:$0xff]   ;;  %v2608_v13 = vld [vmem:[%s3146_s3 + $0x98] sm:$0xff]  }
  0x3d   : > { %2453 = vmatpush3.bf16.msra.mxu0 %v2562_v37  ;;  %v2611_v14 = vld [vmem:[%s3146_s3 + $0x90] sm:$0xff]   ;;  %v2612_v15 = vld [vmem:[%s3146_s3 + $0x88] sm:$0xff]   ;;  %v2615_v16 = vld [vmem:[%s3146_s3 + $0x80] sm:$0xff]  }
  0x3e   : > { %2454 = vmatprep.subr.bf16.mxu0 %v2571_v42  ;;  %v2992_v17 = vld [vmem:[%s3145_s2] ss:$0 sm:$0xff]  ;;  %v2997_v18 = vld [vmem:[%s3145_s2 + $0x1] ss:$0 sm:$0xff] }
  0x3f   : > { %2329 = vmatpush3.bf16.msra.mxu1 %v2583_v53 }
  0x40   : > { %2417 = vmatmul.mubr.msk.bf16.gmra.mxu0 %vm545_vm0, %v2560_v38  ;;  %2439 = vmatmul.mubr.msk.bf16.gmra.mxu1 %vm545_vm0, %v2561_v39 }
  0x41   : > { %2420 = vmatprep.mubr.msk.bf16.mxu0 %vm545_vm0, %v2563_v40  ;;  %2442 = vmatprep.mubr.msk.bf16.mxu1 %vm545_vm0, %v2564_v41 }
  0x42   : > { %2455 = vmatpush3.bf16.msra.mxu0 %v2571_v42  ;;  %2330 = vmatprep.subr.bf16.mxu1 %v2584_v54 }
  0x43   : > { %2331 = vmatpush3.bf16.msra.mxu1 %v2585_v62  ;;  %2472 = vmatprep.subr.bf16.mxu0 %v2599_v9 }
  0x44   : > { %2332 = vmatprep.subr.bf16.mxu1 %v2586_v63 }
  0x47   : > { %2333 = vmatpush3.bf16.msra.mxu1 %v2587_v0 }
  0x48   : > { %2421 = vmatmul.mubr.msk.bf16.gmra.mxu0 %vm545_vm0, %v2565_v43  ;;  %2443 = vmatmul.mubr.msk.bf16.gmra.mxu1 %vm545_vm0, %v2566_v44 }
  0x49   : > { %2424 = vmatprep.mubr.msk.bf16.mxu0 %vm545_vm0, %v2567_v45  ;;  %2446 = vmatprep.mubr.msk.bf16.mxu1 %vm545_vm0, %v2568_v46 }
  0x4a   : > { %2334 = vmatprep.subr.bf16.mxu1 %v2588_v1 }
  0x4b   : > { %2335 = vmatpush3.bf16.msra.mxu1 %v2589_v2 }
  0x4c   : > { %2336 = vmatprep.subr.bf16.mxu1 %v2590_v3 }
  0x4f   : > { %2337 = vmatpush3.bf16.msra.mxu1 %v2591_v4 }
  0x50   : > { %2425 = vmatmul.mubr.msk.bf16.gmra.mxu0 %vm545_vm0, %v2569_v47  ;;  %2447 = vmatmul.mubr.msk.bf16.gmra.mxu1 %vm545_vm0, %v2570_v48 }
  0x51   : > { %2456 = vmatprep.mubr.msk.bf16.mxu0 %vm545_vm0, %v2572_v49  ;;  %2338 = vmatprep.subr.bf16.mxu1 %v2592_v5 }
  0x53   : > { %2339 = vmatpush3.bf16.msra.mxu1 %v2593_v6 }
  0x54   : > { %2340 = vmatprep.subr.bf16.mxu1 %v2594_v7 }
  0x57   : > { %2341 = vmatpush3.bf16.msra.mxu1 %v2595_v8 }
  0x58   : > { %2457 = vmatmul.mubr.msk.bf16.vlgmr.msra.gmra.mxu0 %vm545_vm0, %v2573_v55 }
  0x59   : > { %2460 = vmatprep.mubr.msk.bf16.mxu0 %vm545_vm0, %v2574_v56  ;;  %2473 = vmatpush3.bf16.msra.mxu0 %v2599_v9 }
  0x5a   : > { %2474 = vmatprep.subr.bf16.mxu0 %v2602_v10 }
  0x5d   : > { %2475 = vmatpush3.bf16.msra.mxu0 %v2602_v10 }
  0x5e   : > { %2476 = vmatprep.subr.bf16.mxu0 %v2603_v11 }
  0x60   : > { %2461 = vmatmul.mubr.msk.bf16.gmra.mxu0 %vm545_vm0, %v2575_v57 }
  0x61   : > { %2464 = vmatprep.mubr.msk.bf16.mxu0 %vm545_vm0, %v2576_v58  ;;  %2477 = vmatpush3.bf16.msra.mxu0 %v2603_v11 }
  0x62   : > { %2478 = vmatprep.subr.bf16.mxu0 %v2606_v12 }
  0x65   : > { %2479 = vmatpush3.bf16.msra.mxu0 %v2606_v12 }
  0x66   : > { %2480 = vmatprep.subr.bf16.mxu0 %v2608_v13 }
  0x68   : > { %2465 = vmatmul.mubr.msk.bf16.gmra.mxu0 %vm545_vm0, %v2577_v59 }
  0x69   : > { %2468 = vmatprep.mubr.msk.bf16.mxu0 %vm545_vm0, %v2578_v60  ;;  %2481 = vmatpush3.bf16.msra.mxu0 %v2608_v13 }
  0x6a   : > { %2482 = vmatprep.subr.bf16.mxu0 %v2611_v14 }
  0x6d   : > { %2483 = vmatpush3.bf16.msra.mxu0 %v2611_v14 }
  0x6e   : > { %2484 = vmatprep.subr.bf16.mxu0 %v2612_v15 }
  0x70   : > { %2469 = vmatmul.mubr.msk.bf16.gmra.mxu0 %vm545_vm0, %v2579_v61 }
  0x71   : > { %2485 = vmatpush3.bf16.msra.mxu0 %v2612_v15 }
  0x72   : > { %2486 = vmatprep.subr.bf16.mxu0 %v2615_v16 }
  0x75   : > { %2487 = vmatpush3.bf16.msra.mxu0 %v2615_v16 }
  0xf8   : > { %v2414_v19 = vpop.f32.mrf.mxu0  ;;  %v2436_v21 = vpop.f32.mrf.mxu1 }
  0xf9   : > { %v613_v20 = vadd.f32 %v2414_v19, %v2992_v17  ;;  %v920_v22 = vadd.f32 %v2436_v21, %v2997_v18 }
  0xfa   : > { %v604_v23 = vpop.f32.mrf.mxu0  ;;  %v911_v26 = vpop.f32.mrf.mxu1 }
  0xfb   : > { %v669_v24 = vmax.f32 %v613_v20, 0.0  ;;  %v605_v25 = vadd.f32 %v2992_v17, %v604_v23  ;;  %v976_v27 = vmax.f32 %v920_v22, 0.0  ;;  %v912_v28 = vadd.f32 %v2997_v18, %v911_v26 }
  0xfc   : > { %v2415_v29 = vpop.f32.mrf.mxu0  ;;  %v2437_v33 = vpop.f32.mrf.mxu1 }
  0xfd   : > { %v2246_v30 = vpack.c.bf16 %v669_v24, %v669_v24  ;;  %v667_v31 = vmax.f32 %v605_v25, 0.0  ;;  %v616_v32 = vadd.f32 %v2415_v29, %v2992_v17  ;;  %v2262_v34 = vpack.c.bf16 %v976_v27, %v976_v27 }
  0xfe   : > { %v974_v35 = vmax.f32 %v912_v28, 0.0  ;;  %v923_v36 = vadd.f32 %v2437_v33, %v2997_v18  ;;  %v607_v37 = vpop.f32.mrf.mxu0  ;;  %v914_v41 = vpop.f32.mrf.mxu1 }
  0xff   : > { %749 = vst [vmem:[#allocation2 + $0x18] sm:$0xf] %v2246_v30  ;;  %v2244_v38 = vpack.c.bf16 %v667_v31, %v667_v31  ;;  %v670_v39 = vmax.f32 %v616_v32, 0.0  ;;  %v608_v40 = vadd.f32 %v2992_v17, %v607_v37  ;;  %1056 = vst [vmem:[#allocation2 + $0x1c] sm:$0xf] %v2262_v34  ;;  %v915_v44 = vadd.f32 %v2997_v18, %v914_v41 }
 0x100   : > { %v2260_v42 = vpack.c.bf16 %v974_v35, %v974_v35  ;;  %v977_v43 = vmax.f32 %v923_v36, 0.0  ;;  %v2418_v45 = vpop.f32.mrf.mxu0  ;;  %v2440_v49 = vpop.f32.mrf.mxu1 }
 0x101   : > { %747 = vst [vmem:[#allocation2] sm:$0xf] %v2244_v38  ;;  %v2247_v46 = vpack.c.bf16 %v670_v39, %v670_v39  ;;  %v668_v47 = vmax.f32 %v608_v40, 0.0  ;;  %v629_v48 = vadd.f32 %v2418_v45, %v2992_v17  ;;  %v975_v51 = vmax.f32 %v915_v44, 0.0 }
 0x102   : > { %1054 = vst [vmem:[#allocation2 + $0x4] sm:$0xf] %v2260_v42  ;;  %v2263_v50 = vpack.c.bf16 %v977_v43, %v977_v43  ;;  %v936_v52 = vadd.f32 %v2440_v49, %v2997_v18  ;;  %v620_v53 = vpop.f32.mrf.mxu0  ;;  %v927_v57 = vpop.f32.mrf.mxu1 }
 0x103   : > { %750 = vst [vmem:[#allocation2 + $0x24] sm:$0xf] %v2247_v46  ;;  %v2245_v54 = vpack.c.bf16 %v668_v47, %v668_v47  ;;  %v673_v55 = vmax.f32 %v629_v48, 0.0  ;;  %v621_v56 = vadd.f32 %v2992_v17, %v620_v53  ;;  %v2261_v58 = vpack.c.bf16 %v975_v51, %v975_v51 }
 0x104   : > { %1057 = vst [vmem:[#allocation2 + $0x28] sm:$0xf] %v2263_v50  ;;  %v980_v59 = vmax.f32 %v936_v52, 0.0  ;;  %v928_v60 = vadd.f32 %v2997_v18, %v927_v57  ;;  %v2419_v61 = vpop.f32.mrf.mxu0  ;;  %v2441_v1 = vpop.f32.mrf.mxu1 }
 0x105   : > { %748 = vst [vmem:[#allocation2 + $0xc] sm:$0xf] %v2245_v54  ;;  %v2250_v62 = vpack.c.bf16 %v673_v55, %v673_v55  ;;  %v671_v63 = vmax.f32 %v621_v56, 0.0  ;;  %v632_v0 = vadd.f32 %v2419_v61, %v2992_v17  ;;  %1055 = vst [vmem:[#allocation2 + $0x10] sm:$0xf] %v2261_v58  ;;  %v939_v4 = vadd.f32 %v2441_v1, %v2997_v18 }
 0x106   : > { %v2266_v2 = vpack.c.bf16 %v980_v59, %v980_v59  ;;  %v978_v3 = vmax.f32 %v928_v60, 0.0  ;;  %v623_v5 = vpop.f32.mrf.mxu0  ;;  %v930_v9 = vpop.f32.mrf.mxu1 }
 0x107   : > { %753 = vst [vmem:[#allocation2 + $0x48] sm:$0xf] %v2250_v62  ;;  %v2248_v6 = vpack.c.bf16 %v671_v63, %v671_v63  ;;  %v674_v7 = vmax.f32 %v632_v0, 0.0  ;;  %v624_v8 = vadd.f32 %v2992_v17, %v623_v5  ;;  %v981_v11 = vmax.f32 %v939_v4, 0.0  ;;  %v1381_v5 = vld [vmem:[#allocation2 + $0x18] sm:$0xff] }
 0x108   : > { %1060 = vst [vmem:[#allocation2 + $0x4c] sm:$0xf] %v2266_v2  ;;  %v2264_v10 = vpack.c.bf16 %v978_v3, %v978_v3  ;;  %v931_v12 = vadd.f32 %v2997_v18, %v930_v9  ;;  %v2422_v13 = vpop.f32.mrf.mxu0  ;;  %v2444_v19 = vpop.f32.mrf.mxu1 }
 0x109   : > { %751 = vst [vmem:[#allocation2 + $0x30] sm:$0xf] %v2248_v6  ;;  %v2251_v14 = vpack.c.bf16 %v674_v7, %v674_v7  ;;  %v672_v15 = vmax.f32 %v624_v8, 0.0  ;;  %v645_v16 = vadd.f32 %v2422_v13, %v2992_v17  ;;  %v2267_v20 = vpack.c.bf16 %v981_v11, %v981_v11  ;;  %v3032_v13 = vld [vmem:[%s3145_s2 + $0x2] ss:$0 sm:$0xff] }
 0x10a   : > { %1058 = vst [vmem:[#allocation2 + $0x34] sm:$0xf] %v2264_v10  ;;  %v979_v21 = vmax.f32 %v931_v12, 0.0  ;;  %v952_v22 = vadd.f32 %v2444_v19, %v2997_v18  ;;  %v636_v23 = vpop.f32.mrf.mxu0  ;;  %v943_v27 = vpop.f32.mrf.mxu1 }
 0x10b   : > { %754 = vst [vmem:[#allocation2 + $0x54] sm:$0xf] %v2251_v14  ;;  %v2249_v24 = vpack.c.bf16 %v672_v15, %v672_v15  ;;  %v677_v25 = vmax.f32 %v645_v16, 0.0  ;;  %v637_v26 = vadd.f32 %v2992_v17, %v636_v23  ;;  %1061 = vst [vmem:[#allocation2 + $0x58] sm:$0xf] %v2267_v20  ;;  %v944_v30 = vadd.f32 %v2997_v18, %v943_v27  ;;  %v1383_v61 = vld [vmem:[#allocation2 + $0x24] sm:$0xff] }
 0x10c   : > { %v2265_v28 = vpack.c.bf16 %v979_v21, %v979_v21  ;;  %v984_v29 = vmax.f32 %v952_v22, 0.0  ;;  %v2423_v31 = vpop.f32.mrf.mxu0  ;;  %v2445_v35 = vpop.f32.mrf.mxu1  ;;  %v2596_v36 = vld [vmem:[#allocation2] ss:$12 sps:$4 sm:$0xff]   ;;  %v2598_v37 = vld [vmem:[#allocation2 + $0x4] ss:$12 sps:$4 sm:$0xff]   ;;  %v2193_v14 = vcombine.low %v1381_v5, %v1383_v61 }
 0x10d   : > { %752 = vst [vmem:[#allocation2 + $0x3c] sm:$0xf] %v2249_v24  ;;  %v2254_v32 = vpack.c.bf16 %v677_v25, %v677_v25  ;;  %v675_v33 = vmax.f32 %v637_v26, 0.0  ;;  %v648_v34 = vadd.f32 %v2423_v31, %v2992_v17  ;;  %v982_v39 = vmax.f32 %v944_v30, 0.0  ;;  %1768 = vmatprep.mubr.bf16.mxu1 %v2598_v37  ;;  %v2600_v46 = vld [vmem:[#allocation2 + $0x1c] ss:$12 sps:$4 sm:$0xff]  }
 0x10e   : > { %1059 = vst [vmem:[#allocation2 + $0x40] sm:$0xf] %v2265_v28  ;;  %v2270_v38 = vpack.c.bf16 %v984_v29, %v984_v29  ;;  %v955_v40 = vadd.f32 %v2445_v35, %v2997_v18  ;;  %v639_v41 = vpop.f32.mrf.mxu0  ;;  %v946_v45 = vpop.f32.mrf.mxu1  ;;  %1769 = vmatmul.mubr.bf16.vlgmr.msra.gmra.mxu1 %v2596_v36 }
 0x10f   : > { %757 = vst [vmem:[#allocation2 + $0x78] sm:$0xf] %v2254_v32  ;;  %v2252_v42 = vpack.c.bf16 %v675_v33, %v675_v33  ;;  %v678_v43 = vmax.f32 %v648_v34, 0.0  ;;  %v640_v44 = vadd.f32 %v2992_v17, %v639_v41  ;;  %v2268_v47 = vpack.c.bf16 %v982_v39, %v982_v39  ;;  %1776 = vmatprep.mubr.bf16.mxu1 %v2600_v46 }
 0x110   : > { %1064 = vst [vmem:[#allocation2 + $0x7c] sm:$0xf] %v2270_v38  ;;  %v985_v48 = vmax.f32 %v955_v40, 0.0  ;;  %v947_v49 = vadd.f32 %v2997_v18, %v946_v45  ;;  %v2426_v50 = vpop.f32.mrf.mxu0  ;;  %v2448_v54 = vpop.f32.mrf.mxu1 }
 0x111   : > { %755 = vst [vmem:[#allocation2 + $0x60] sm:$0xf] %v2252_v42  ;;  %v2255_v51 = vpack.c.bf16 %v678_v43, %v678_v43  ;;  %v676_v52 = vmax.f32 %v640_v44, 0.0  ;;  %v661_v53 = vadd.f32 %v2426_v50, %v2992_v17  ;;  %1062 = vst [vmem:[#allocation2 + $0x64] sm:$0xf] %v2268_v47  ;;  %v968_v57 = vadd.f32 %v2448_v54, %v2997_v18 }
 0x112   : > { %v2271_v55 = vpack.c.bf16 %v985_v48, %v985_v48  ;;  %v983_v56 = vmax.f32 %v947_v49, 0.0  ;;  %v652_v58 = vpop.f32.mrf.mxu0  ;;  %v959_v63 = vpop.f32.mrf.mxu1  ;;  %v2609_v43 = vld [vmem:[#allocation2 + $0x4c] ss:$12 sps:$4 sm:$0xff]  }
 0x113   : > { %758 = vst [vmem:[#allocation2 + $0x84] sm:$0xf] %v2255_v51  ;;  %v2253_v59 = vpack.c.bf16 %v676_v52, %v676_v52  ;;  %v681_v60 = vmax.f32 %v661_v53, 0.0  ;;  %v653_v62 = vadd.f32 %v2992_v17, %v652_v58  ;;  %v988_v1 = vmax.f32 %v968_v57, 0.0  ;;  %v1389_v51 = vld [vmem:[#allocation2 + $0x48] sm:$0xff]  ;;  %v1391_v52 = vld [vmem:[#allocation2 + $0x54] sm:$0xff] }
 0x114   : > { %1065 = vst [vmem:[#allocation2 + $0x88] sm:$0xf] %v2271_v55  ;;  %v2269_v0 = vpack.c.bf16 %v983_v56, %v983_v56  ;;  %v960_v2 = vadd.f32 %v2997_v18, %v959_v63  ;;  %v2427_v3 = vpop.f32.mrf.mxu0  ;;  %v2449_v8 = vpop.f32.mrf.mxu1  ;;  %v2607_v39 = vld [vmem:[#allocation2 + $0x30] ss:$12 sps:$4 sm:$0xff]  }
 0x115   : > { %756 = vst [vmem:[#allocation2 + $0x6c] sm:$0xf] %v2253_v59  ;;  %v2258_v4 = vpack.c.bf16 %v681_v60, %v681_v60  ;;  %v679_v6 = vmax.f32 %v653_v62, 0.0  ;;  %v664_v7 = vadd.f32 %v2427_v3, %v2992_v17  ;;  %v2274_v9 = vpack.c.bf16 %v988_v1, %v988_v1  ;;  %v2604_v21 = vld [vmem:[#allocation2 + $0x34] ss:$12 sps:$4 sm:$0xff]  }
 0x116   : > { %1063 = vst [vmem:[#allocation2 + $0x70] sm:$0xf] %v2269_v0  ;;  %v986_v10 = vmax.f32 %v960_v2, 0.0  ;;  %v971_v11 = vadd.f32 %v2449_v8, %v2997_v18  ;;  %v655_v12 = vpop.f32.mrf.mxu0  ;;  %v962_v20 = vpop.f32.mrf.mxu1  ;;  %1777 = vmatmul.mubr.bf16.gmra.mxu1 %v2193_v14  ;;  %v2199_v59 = vcombine.low %v1389_v51, %v1391_v52 }
 0x117   : > { %761 = vst [vmem:[#allocation2 + $0xa8] sm:$0xf] %v2258_v4  ;;  %v2256_v15 = vpack.c.bf16 %v679_v6, %v679_v6  ;;  %v682_v16 = vmax.f32 %v664_v7, 0.0  ;;  %v656_v19 = vadd.f32 %v2992_v17, %v655_v12  ;;  %1068 = vst [vmem:[#allocation2 + $0xac] sm:$0xf] %v2274_v9  ;;  %v963_v24 = vadd.f32 %v2997_v18, %v962_v20 }
 0x118   : > { %v2272_v22 = vpack.c.bf16 %v986_v10, %v986_v10  ;;  %v989_v23 = vmax.f32 %v971_v11, 0.0  ;;  %v2458_v25 = vpop.f32.mrf.mxu0  ;;  %1784 = vmatprep.mubr.bf16.mxu1 %v2604_v21  ;;  %v1393_v12 = vld [vmem:[#allocation2 + $0x60] sm:$0xff] }
 0x119   : > { %759 = vst [vmem:[#allocation2 + $0x90] sm:$0xf] %v2256_v15  ;;  %v2259_v26 = vpack.c.bf16 %v682_v16, %v682_v16  ;;  %v680_v27 = vmax.f32 %v656_v19, 0.0  ;;  %v1227_v28 = vadd.f32 %v2458_v25, %v3032_v13  ;;  %v987_v30 = vmax.f32 %v963_v24, 0.0 }
 0x11a   : > { %1066 = vst [vmem:[#allocation2 + $0x94] sm:$0xf] %v2272_v22  ;;  %v2275_v29 = vpack.c.bf16 %v989_v23, %v989_v23  ;;  %v1218_v31 = vpop.f32.mrf.mxu0 }
 0x11b   : > { %762 = vst [vmem:[#allocation2 + $0xb4] sm:$0xf] %v2259_v26  ;;  %v2257_v17 = vpack.c.bf16 %v680_v27, %v680_v27  ;;  %v1283_v32 = vmax.f32 %v1227_v28, 0.0  ;;  %v1219_v33 = vadd.f32 %v3032_v13, %v1218_v31  ;;  %v2273_v34 = vpack.c.bf16 %v987_v30, %v987_v30  ;;  %v2618_v24 = vld [vmem:[#allocation2 + $0x7c] ss:$12 sps:$4 sm:$0xff]  }
 0x11c   : > { %1069 = vst [vmem:[#allocation2 + $0xb8] sm:$0xf] %v2275_v29  ;;  %v2459_v18 = vpop.f32.mrf.mxu0 }
 0x11d   : > { %760 = vst [vmem:[#allocation2 + $0x9c] sm:$0xf] %v2257_v17  ;;  %v2278_v35 = vpack.c.bf16 %v1283_v32, %v1283_v32  ;;  %v1281_v36 = vmax.f32 %v1219_v33, 0.0  ;;  %v1230_v37 = vadd.f32 %v2459_v18, %v3032_v13  ;;  %1067 = vst [vmem:[#allocation2 + $0xa0] sm:$0xf] %v2273_v34  ;;  %v1395_v7 = vld [vmem:[#allocation2 + $0x6c] sm:$0xff] }
 0x11e   : > { %v1221_v38 = vpop.f32.mrf.mxu0  ;;  %1785 = vmatmul.mubr.bf16.gmra.mxu1 %v2607_v39  ;;  %v2613_v63 = vld [vmem:[#allocation2 + $0x64] ss:$12 sps:$4 sm:$0xff]   ;;  %v2202_v20 = vcombine.low %v1393_v12, %v1395_v7 }
 0x11f   : > { %1363 = vst [vmem:[#allocation2 + $0x20] sm:$0xf] %v2278_v35  ;;  %v2276_v40 = vpack.c.bf16 %v1281_v36, %v1281_v36  ;;  %v1284_v41 = vmax.f32 %v1230_v37, 0.0  ;;  %v1222_v42 = vadd.f32 %v3032_v13, %v1221_v38  ;;  %1792 = vmatprep.mubr.bf16.mxu1 %v2609_v43  ;;  %v2621_v38 = vld [vmem:[#allocation2 + $0x78] ss:$12 sps:$4 sm:$0xff]  }
 0x120   : > { %v2462_v44 = vpop.f32.mrf.mxu0 }
 0x121   : > { %1361 = vst [vmem:[#allocation2 + $0x8] sm:$0xf] %v2276_v40  ;;  %v2279_v45 = vpack.c.bf16 %v1284_v41, %v1284_v41  ;;  %v1282_v46 = vmax.f32 %v1222_v42, 0.0  ;;  %v1243_v47 = vadd.f32 %v2462_v44, %v3032_v13 }
 0x122   : > { %v1234_v48 = vpop.f32.mrf.mxu0  ;;  %v2631_v51 = vld [vmem:[#allocation2 + $0xa8] ss:$12 sps:$4 sm:$0xff]  }
 0x123   : > { %1364 = vst [vmem:[#allocation2 + $0x2c] sm:$0xf] %v2279_v45  ;;  %v2277_v49 = vpack.c.bf16 %v1282_v46, %v1282_v46  ;;  %v1287_v50 = vmax.f32 %v1243_v47, 0.0  ;;  %v1235_v53 = vadd.f32 %v3032_v13, %v1234_v48 }
 0x124   : > { %v2463_v54 = vpop.f32.mrf.mxu0  ;;  %v2623_v42 = vld [vmem:[#allocation2 + $0x94] ss:$12 sps:$4 sm:$0xff]   ;;  %v2626_v48 = vld [vmem:[#allocation2 + $0x90] ss:$12 sps:$4 sm:$0xff]  }
 0x125   : > { %1362 = vst [vmem:[#allocation2 + $0x14] sm:$0xf] %v2277_v49  ;;  %v2282_v55 = vpack.c.bf16 %v1287_v50, %v1287_v50  ;;  %v1285_v56 = vmax.f32 %v1235_v53, 0.0  ;;  %v1246_v57 = vadd.f32 %v2463_v54, %v3032_v13  ;;  %v2628_v49 = vld [vmem:[#allocation2 + $0xac] ss:$12 sps:$4 sm:$0xff]  }
 0x126   : > { %v1237_v58 = vpop.f32.mrf.mxu0  ;;  %1793 = vmatmul.mubr.bf16.gmra.mxu1 %v2199_v59 }
 0x127   : > { %1367 = vst [vmem:[#allocation2 + $0x50] sm:$0xf] %v2282_v55  ;;  %v2280_v60 = vpack.c.bf16 %v1285_v56, %v1285_v56  ;;  %v1288_v61 = vmax.f32 %v1246_v57, 0.0  ;;  %v1238_v62 = vadd.f32 %v3032_v13, %v1237_v58  ;;  %1800 = vmatprep.mubr.bf16.mxu1 %v2613_v63 }
 0x128   : > { %v2466_v0 = vpop.f32.mrf.mxu0 }
 0x129   : > { %1365 = vst [vmem:[#allocation2 + $0x38] sm:$0xf] %v2280_v60  ;;  %v2283_v1 = vpack.c.bf16 %v1288_v61, %v1288_v61  ;;  %v1286_v2 = vmax.f32 %v1238_v62, 0.0  ;;  %v1259_v3 = vadd.f32 %v2466_v0, %v3032_v13 }
 0x12a   : > { %v1250_v4 = vpop.f32.mrf.mxu0  ;;  %v2617_v16 = vld [vmem:[#allocation2 + $0x20] ss:$12 sps:$4 sm:$0xff]  }
 0x12b   : > { %1368 = vst [vmem:[#allocation2 + $0x5c] sm:$0xf] %v2283_v1  ;;  %v2281_v5 = vpack.c.bf16 %v1286_v2, %v1286_v2  ;;  %v1291_v6 = vmax.f32 %v1259_v3, 0.0  ;;  %v1251_v8 = vadd.f32 %v3032_v13, %v1250_v4 }
 0x12c   : > { %v2467_v9 = vpop.f32.mrf.mxu0  ;;  %v2616_v10 = vld [vmem:[#allocation2 + $0x8] ss:$12 sps:$4 sm:$0xff]  }
 0x12d   : > { %1366 = vst [vmem:[#allocation2 + $0x44] sm:$0xf] %v2281_v5  ;;  %v2286_v11 = vpack.c.bf16 %v1291_v6, %v1291_v6  ;;  %v1289_v14 = vmax.f32 %v1251_v8, 0.0  ;;  %v1262_v15 = vadd.f32 %v2467_v9, %v3032_v13  ;;  %2488 = vmatprep.mubr.bf16.mxu0 %v2616_v10  ;;  %v3056_v5 = vld [vmem:[%s3147_s4] ss:$0 sm:$0xff] }
 0x12e   : > { %v1253_v19 = vpop.f32.mrf.mxu0  ;;  %2489 = vmatmul.mubr.bf16.vlgmr.msra.gmra.mxu0 %v2617_v16  ;;  %1801 = vmatmul.mubr.bf16.gmra.mxu1 %v2202_v20 }
 0x12f   : > { %1371 = vst [vmem:[#allocation2 + $0x80] sm:$0xf] %v2286_v11  ;;  %v2284_v21 = vpack.c.bf16 %v1289_v14, %v1289_v14  ;;  %v1292_v22 = vmax.f32 %v1262_v15, 0.0  ;;  %v1254_v23 = vadd.f32 %v3032_v13, %v1253_v19  ;;  %1808 = vmatprep.mubr.bf16.mxu1 %v2618_v24 }
 0x130   : > { %v2470_v25 = vpop.f32.mrf.mxu0 }
 0x131   : > { %1369 = vst [vmem:[#allocation2 + $0x68] sm:$0xf] %v2284_v21  ;;  %v2287_v26 = vpack.c.bf16 %v1292_v22, %v1292_v22  ;;  %v1290_v27 = vmax.f32 %v1254_v23, 0.0  ;;  %v1275_v28 = vadd.f32 %v2470_v25, %v3032_v13 }
 0x132   : > { %v1266_v29 = vpop.f32.mrf.mxu0  ;;  %v2622_v36 = vld [vmem:[#allocation2 + $0x50] ss:$12 sps:$4 sm:$0xff]  }
 0x133   : > { %1372 = vst [vmem:[#allocation2 + $0x8c] sm:$0xf] %v2287_v26  ;;  %v2285_v30 = vpack.c.bf16 %v1290_v27, %v1290_v27  ;;  %v1295_v31 = vmax.f32 %v1275_v28, 0.0  ;;  %v1267_v17 = vadd.f32 %v3032_v13, %v1266_v29 }
 0x134   : > { %v2471_v32 = vpop.f32.mrf.mxu0  ;;  %v2620_v33 = vld [vmem:[#allocation2 + $0x38] ss:$12 sps:$4 sm:$0xff]  }
 0x135   : > { %1370 = vst [vmem:[#allocation2 + $0x74] sm:$0xf] %v2285_v30  ;;  %v2290_v34 = vpack.c.bf16 %v1295_v31, %v1295_v31  ;;  %v1293_v18 = vmax.f32 %v1267_v17, 0.0  ;;  %v1278_v35 = vadd.f32 %v2471_v32, %v3032_v13  ;;  %2492 = vmatprep.mubr.bf16.mxu0 %v2620_v33 }
 0x136   : > { %v1269_v37 = vpop.f32.mrf.mxu0  ;;  %2493 = vmatmul.mubr.bf16.gmra.mxu0 %v2622_v36  ;;  %1809 = vmatmul.mubr.bf16.gmra.mxu1 %v2621_v38 }
 0x137   : > { %1375 = vst [vmem:[#allocation2 + $0xb0] sm:$0xf] %v2290_v34  ;;  %v2288_v39 = vpack.c.bf16 %v1293_v18, %v1293_v18  ;;  %v1296_v40 = vmax.f32 %v1278_v35, 0.0  ;;  %v1270_v41 = vadd.f32 %v3032_v13, %v1269_v37  ;;  %1816 = vmatprep.mubr.bf16.mxu1 %v2623_v42 }
 0x139   : > { %1373 = vst [vmem:[#allocation2 + $0x98] sm:$0xf] %v2288_v39  ;;  %v2291_v43 = vpack.c.bf16 %v1296_v40, %v1296_v40  ;;  %v1294_v44 = vmax.f32 %v1270_v41, 0.0 }
 0x13a   : > { %v2627_v47 = vld [vmem:[#allocation2 + $0x80] ss:$12 sps:$4 sm:$0xff]  }
 0x13b   : > { %1376 = vst [vmem:[#allocation2 + $0xbc] sm:$0xf] %v2291_v43  ;;  %v2289_v45 = vpack.c.bf16 %v1294_v44, %v1294_v44 }
 0x13c   : > { %v2625_v46 = vld [vmem:[#allocation2 + $0x68] ss:$12 sps:$4 sm:$0xff]  }
 0x13d   : > { %1374 = vst [vmem:[#allocation2 + $0xa4] sm:$0xf] %v2289_v45  ;;  %2496 = vmatprep.mubr.bf16.mxu0 %v2625_v46 }
 0x13e   : > { %2497 = vmatmul.mubr.bf16.gmra.mxu0 %v2627_v47  ;;  %1817 = vmatmul.mubr.bf16.gmra.mxu1 %v2626_v48 }
 0x13f   : > { %1824 = vmatprep.mubr.bf16.mxu1 %v2628_v49 }
 0x142   : > { %v2632_v13 = vld [vmem:[#allocation2 + $0xb0] ss:$12 sps:$4 sm:$0xff]  }
 0x144   : > { %v2630_v50 = vld [vmem:[#allocation2 + $0x98] ss:$12 sps:$4 sm:$0xff]  }
 0x145   : > { %2500 = vmatprep.mubr.bf16.mxu0 %v2630_v50 }
 0x146   : > { %2501 = vmatmul.mubr.bf16.gmra.mxu0 %v2632_v13  ;;  %1825 = vmatmul.mubr.bf16.gmra.mxu1 %v2631_v51 }
 0x1ce   : > { %v2342_v52 = vpop.f32.mrf.mxu1 }
 0x1d0   : > { %v2343_v53 = vpop.f32.mrf.mxu1 }
 0x1d1   : > { %v2344_v3 = vadd.f32 %v2343_v53, %v2342_v52 }
 0x1d2   : > { %v2345_v54 = vpop.f32.mrf.mxu1 }
 0x1d3   : > { %v1771_v14 = vadd.f32 %v2344_v3, %v3056_v5 }
 0x1d4   : > { %v2346_v55 = vpop.f32.mrf.mxu1 }
 0x1d5   : > { %v2347_v10 = vadd.f32 %v2346_v55, %v2345_v54 }
 0x1d6   : > { %v2348_v56 = vpop.f32.mrf.mxu1 }
 0x1d7   : > { %v1774_v26 = vadd.f32 %v2347_v10, %v3056_v5 }
 0x1d8   : > { %v2349_v57 = vpop.f32.mrf.mxu1 }
 0x1d9   : > { %v2350_v1 = vadd.f32 %v2349_v57, %v2348_v56 }
 0x1da   : > { %v2351_v58 = vpop.f32.mrf.mxu1 }
 0x1db   : > { %v1779_v8 = vadd.f32 %v2350_v1, %v3056_v5 }
 0x1dc   : > { %v2352_v59 = vpop.f32.mrf.mxu1 }
 0x1dd   : > { %v2353_v6 = vadd.f32 %v2352_v59, %v2351_v58 }
 0x1de   : > { %v2354_v60 = vpop.f32.mrf.mxu1 }
 0x1df   : > { %v1782_v21 = vadd.f32 %v2353_v6, %v3056_v5 }
 0x1e0   : > { %v2355_v61 = vpop.f32.mrf.mxu1 }
 0x1e1   : > { %v2356_v23 = vadd.f32 %v2355_v61, %v2354_v60 }
 0x1e2   : > { %v2357_v62 = vpop.f32.mrf.mxu1 }
 0x1e3   : > { %v1787_v18 = vadd.f32 %v2356_v23, %v3056_v5 }
 0x1e4   : > { %v2358_v63 = vpop.f32.mrf.mxu1 }
 0x1e5   : > { %v2359_v32 = vadd.f32 %v2358_v63, %v2357_v62 }
 0x1e6   : > { %v2360_v0 = vpop.f32.mrf.mxu1 }
 0x1e7   : > { %v1790_v44 = vadd.f32 %v2359_v32, %v3056_v5 }
 0x1e8   : > { %v2361_v2 = vpop.f32.mrf.mxu1 }
 0x1e9   : > { %v2362_v16 = vadd.f32 %v2361_v2, %v2360_v0 }
 0x1ea   : > { %v2363_v4 = vpop.f32.mrf.mxu1 }
 0x1eb   : > { %v1795_v31 = vadd.f32 %v2362_v16, %v3056_v5 }
 0x1ec   : > { %v2364_v7 = vpop.f32.mrf.mxu1 }
 0x1ed   : > { %v2365_v28 = vadd.f32 %v2364_v7, %v2363_v4 }
 0x1ee   : > { %v2490_v9 = vpop.f32.mrf.mxu0  ;;  %v2366_v11 = vpop.f32.mrf.mxu1 }
 0x1ef   : > { %v1876_v12 = vadd.f32 %v2490_v9, %v1779_v8  ;;  %v1798_v38 = vadd.f32 %v2365_v28, %v3056_v5 }
 0x1f0   : > { %v1867_v15 = vpop.f32.mrf.mxu0  ;;  %v2367_v19 = vpop.f32.mrf.mxu1 }
 0x1f1   : > { %1932 = vst [vmem:[%s3060_s16 + $0x10] sm:$0xff] %v1876_v12  ;;  %v1868_v20 = vadd.f32 %v1867_v15, %v1771_v14  ;;  %v2368_v41 = vadd.f32 %v2367_v19, %v2366_v11 }
 0x1f2   : > { %v2491_v22 = vpop.f32.mrf.mxu0  ;;  %v2369_v24 = vpop.f32.mrf.mxu1 }
 0x1f3   : > { %1930 = vst [vmem:[%s3060_s16] sm:$0xff] %v1868_v20  ;;  %v1879_v25 = vadd.f32 %v2491_v22, %v1782_v21  ;;  %v1803_v53 = vadd.f32 %v2368_v41, %v3056_v5 }
 0x1f4   : > { %v1870_v27 = vpop.f32.mrf.mxu0  ;;  %v2370_v29 = vpop.f32.mrf.mxu1 }
 0x1f5   : > { %1933 = vst [vmem:[%s3060_s16 + $0x18] sm:$0xff] %v1879_v25  ;;  %v1871_v30 = vadd.f32 %v1870_v27, %v1774_v26  ;;  %v2371_v13 = vadd.f32 %v2370_v29, %v2369_v24 }
 0x1f6   : > { %v2494_v17 = vpop.f32.mrf.mxu0  ;;  %v2372_v33 = vpop.f32.mrf.mxu1 }
 0x1f7   : > { %1931 = vst [vmem:[%s3060_s16 + $0x8] sm:$0xff] %v1871_v30  ;;  %v1892_v34 = vadd.f32 %v2494_v17, %v1795_v31  ;;  %v1806_v62 = vadd.f32 %v2371_v13, %v3056_v5 }
 0x1f8   : > { %v1883_v35 = vpop.f32.mrf.mxu0  ;;  %v2373_v36 = vpop.f32.mrf.mxu1 }
 0x1f9   : > { %1936 = vst [vmem:[%s3060_s16 + $0x30] sm:$0xff] %v1892_v34  ;;  %v1884_v37 = vadd.f32 %v1883_v35, %v1787_v18  ;;  %v2374_v39 = vadd.f32 %v2373_v36, %v2372_v33 }
 0x1fa   : > { %v2495_v40 = vpop.f32.mrf.mxu0  ;;  %v2375_v42 = vpop.f32.mrf.mxu1 }
 0x1fb   : > { %1934 = vst [vmem:[%s3060_s16 + $0x20] sm:$0xff] %v1884_v37  ;;  %v1895_v43 = vadd.f32 %v2495_v40, %v1798_v38  ;;  %v1811_v48 = vadd.f32 %v2374_v39, %v3056_v5 }
 0x1fc   : > { %v1886_v45 = vpop.f32.mrf.mxu0  ;;  %v2376_v46 = vpop.f32.mrf.mxu1 }
 0x1fd   : > { %1937 = vst [vmem:[%s3060_s16 + $0x38] sm:$0xff] %v1895_v43  ;;  %v1887_v47 = vadd.f32 %v1886_v45, %v1790_v44  ;;  %v2377_v49 = vadd.f32 %v2376_v46, %v2375_v42 }
 0x1fe   : > { %v2498_v50 = vpop.f32.mrf.mxu0  ;;  %v2378_v51 = vpop.f32.mrf.mxu1 }
 0x1ff   : > { %1935 = vst [vmem:[%s3060_s16 + $0x28] sm:$0xff] %v1887_v47  ;;  %v1908_v52 = vadd.f32 %v2498_v50, %v1811_v48  ;;  %v1814_v57 = vadd.f32 %v2377_v49, %v3056_v5 }
 0x200   : > { %v1899_v54 = vpop.f32.mrf.mxu0  ;;  %v2379_v55 = vpop.f32.mrf.mxu1 }
 0x201   : > { %1940 = vst [vmem:[%s3060_s16 + $0x50] sm:$0xff] %v1908_v52  ;;  %v1900_v56 = vadd.f32 %v1899_v54, %v1803_v53  ;;  %v2380_v59 = vadd.f32 %v2379_v55, %v2378_v51 }
 0x202   : > { %v2499_v58 = vpop.f32.mrf.mxu0  ;;  %v2381_v60 = vpop.f32.mrf.mxu1 }
 0x203   : > { %1938 = vst [vmem:[%s3060_s16 + $0x40] sm:$0xff] %v1900_v56  ;;  %v1911_v61 = vadd.f32 %v2499_v58, %v1814_v57  ;;  %v1819_v6 = vadd.f32 %v2380_v59, %v3056_v5 }
 0x204   : > { %v1902_v63 = vpop.f32.mrf.mxu0  ;;  %v2382_v0 = vpop.f32.mrf.mxu1 }
 0x205   : > { %1941 = vst [vmem:[%s3060_s16 + $0x58] sm:$0xff] %v1911_v61  ;;  %v1903_v1 = vadd.f32 %v1902_v63, %v1806_v62  ;;  %v2383_v3 = vadd.f32 %v2382_v0, %v2381_v60 }
 0x206   : > { %v2502_v2 = vpop.f32.mrf.mxu0  ;;  %v2384_v4 = vpop.f32.mrf.mxu1 }
 0x207   : > { %1939 = vst [vmem:[%s3060_s16 + $0x48] sm:$0xff] %v1903_v1  ;;  %v1822_v14 = vadd.f32 %v2383_v3, %v3056_v5 }
 0x208   : > { %v1915_v7 = vpop.f32.mrf.mxu0  ;;  %v2385_v8 = vpop.f32.mrf.mxu1 }
 0x209   : > { %v1916_v9 = vadd.f32 %v1915_v7, %v1819_v6  ;;  %v2386_v10 = vadd.f32 %v2385_v8, %v2384_v4 }
 0x20a   : > { %v2503_v11 = vpop.f32.mrf.mxu0  ;;  %v2387_v12 = vpop.f32.mrf.mxu1 }
 0x20b   : > { %1942 = vst [vmem:[%s3060_s16 + $0x60] sm:$0xff] %v1916_v9  ;;  %v1827_v15 = vadd.f32 %v2386_v10, %v3056_v5 }
 0x20c   : > { %v1918_v16 = vpop.f32.mrf.mxu0  ;;  %v2388_v19 = vpop.f32.mrf.mxu1 }
 0x20d   : > { %v1919_v20 = vadd.f32 %v1918_v16, %v1822_v14  ;;  %v1924_v21 = vadd.f32 %v2502_v2, %v1827_v15  ;;  %v2389_v22 = vadd.f32 %v2388_v19, %v2387_v12 }
 0x20f   : > { %1943 = vst [vmem:[%s3060_s16 + $0x68] sm:$0xff] %v1919_v20  ;;  %1944 = vst [vmem:[%s3060_s16 + $0x70] sm:$0xff] %v1924_v21  ;;  %v1830_v23 = vadd.f32 %v2389_v22, %v3056_v5 }
 0x211   : > { %v1927_v24 = vadd.f32 %v2503_v11, %v1830_v23 }
 0x213   : > { %1945 = vst [vmem:[%s3060_s16 + $0x78] sm:$0xff] %v1927_v24 }
 0x214   : > { %2646 = shalt.err (!%p2643_p5)
}
 0x215   : > { %s2647_s9 = scalar_lea.hbm %s3097_s30, 2048  ;;  %s2651_s13 = scalar_lea.hbm %s3148_s5, 4096 }
 0x216   : > { %p2648_p7 = scmp.ne.s32.totalorder %s3097_s30, %s2647_s9  ;;  %p2652_p12 = scmp.lt.s32.totalorder %s3097_s30, %s3148_s5 }
 0x217   : > { %p2653_p13 = scmp.lt.s32.totalorder %s2651_s13, %s2647_s9 }
 0x218   : > { %p2649_p10 = pnand %p2648_p7, %p2766_p6 }
 0x219   : > { %p2654_p0 = por %p2653_p13, %p2652_p12 }
 0x21a   : > { %p2650_p11 = pneg %p2649_p10 }
 0x21c   : > { %p2655_p1 = pnand %p2654_p0, %p2650_p11 }
 0x21e   : > { %2658 = shalt.err (!%p2655_p1)
}
 0x21f   : > { %s2696_s17 = smov 128   ;;  %s2697_s25 = smov 8  }
 0x220   : > { %2506 = dma.vmem_to_hbm [thread:$0]  (%p2766_p6), %s3099_s23, 2048, %s3097_s30, %s1947_s10, %s2696_s17, %s2696_s17, %s2697_s25  }
 0x221 PF: > { %s1975_s26 = sand.u32 1, %s2681_s18   ;;  %p2509_p2 = pnand %p2030_p9, %p2770_p8 }
 0x222   : > { %s1976_s6 = scalar_lea.sflag [#allocation5], %s1975_s26 }
 0x223   : > { %p2510_p3 = pneg %p2509_p2 }
 0x225   : > { %2676 = dma.done.wait (%p2510_p3), %s1976_s6, 2048  }
 0x226   : > { %2678 = vsyncadd (%p2510_p3), %s1976_s6, 4294965248  ;;  %p15_p4 = scmp.ge.s32.totalorder %s2751_s24, 4   ;;  %s3151_s18 = smov %s2685_s19 }
 0x227   : > { %s3152_s19 = smov %s2689_s20  ;;  %s3153_s20 = smov %s2764_s27 }
 0x228   : > { %s3154_s21 = smov %s2751_s24  ;;  %17 = sbr.rel (!%p15_p4) target bundleno = 3 (0x3), region = 127 }
 0x22d   :  { %1981 = vsyncpa [#allocation5], 1 }
 0x22e   :  { %1983 = vsyncpa [#allocation5 + $0x1], 1 }

// kernel: tpu_custom_call.1
= control target key start
LH: loop header
LB: loop body
LE: loop exit
PB: predicated region body
PF: predicated region fallthrough
CT: control target
= control target key end

     0   :  { %10 = vsyncpa [#allocation5], 0  ;;  %s3143_s0 = inlined_call_operand.vmem [shape: bf16[3,256,48], index: 0, kind: input, shape index: {}]   ;;  %s3144_s1 = inlined_call_operand.vmem [shape: bf16[3,48,128], index: 1, kind: input, shape index: {}]   ;;  %s3145_s2 = inlined_call_operand.vmem [shape: f32[3,1,128], index: 2, kind: input, shape index: {}]   ;;  %s3146_s3 = inlined_call_operand.vmem [shape: bf16[384,128], index: 3, kind: input, shape index: {}]   ;;  %s3147_s4 = inlined_call_operand.vmem [shape: f32[1,128], index: 4, kind: input, shape index: {}]   ;;  %s3148_s5 = inlined_call_operand.hbm [shape: f32[256,128], index: 5, kind: output, shape index: {}]  }
   0x1   :  { %12 = vsyncpa [#allocation5 + $0x1], 0  ;;  %s2728_s18 = smov 0   ;;  %s2730_s19 = smov 0  }
   0x2   :  { %s2732_s20 = smov 0   ;;  %s2734_s21 = smov 0  }
   0x3 LB: > { %s2027_s22 = sadd.s32 4294967295, %s2693_s21   ;;  %s2028_s23 = sadd.s32 4294967294, %s2693_s21   ;;  %s2693_s21 = sphi %s2734_s21, %s3154_s21   ;;  %s2689_s20 = sphi %s2732_s20, %s3153_s20   ;;  %s2685_s19 = sphi %s2730_s19, %s3152_s19   ;;  %s2681_s18 = sphi %s2728_s18, %s3151_s18  }
   0x4   : > { %s2751_s24 = sadd.s32 1, %s2693_s21   ;;  %s25_s25 = sadd.s32 1, %s2689_s20 }
   0x5   : > { %s22_s26 = ssub.s32 %s2693_s21, %s2751_s24  ;;  %p32_p0 = scmp.ne.s32.totalorder %s2689_s20, %s2685_s19 }
   0x6   : > { %p23_p1 = scmp.eq.s32.totalorder %s22_s26, 0  ;;  %p33_p2 = scmp.eq.s32.totalorder %s2693_s21, 0 }
   0x7   : > { %p146_p3 = scmp.eq.s32.totalorder %s2027_s22, 1  ;;  %p151_p4 = scmp.ne.s32.totalorder %s2685_s19, %s2681_s18 }
   0x8   : > { %s2764_s27 = scalar_select %p23_p1, %s2689_s20, %s25_s25  }
   0x9   : > { %p34_p5 = por %p33_p2, %p32_p0  ;;  %p2766_p6 = por %p146_p3, %p32_p0 }
   0xa   : > { %p152_p7 = scmp.eq.s32.totalorder %s2028_s23, 1  ;;  %p2030_p9 = scmp.ge.s32.totalorder %s2693_s21, 2 }
   0xc   : > { %p2770_p8 = por %p152_p7, %p151_p4  ;;  %180 = sbr.rel (%p2030_p9) target bundleno = 34 (0x22), region = 32 }
  0x11   : > { %183 = sbr.rel (!%p34_p5) target bundleno = 34 (0x22), region = 36  ;;  %s185_s30 = sand.u32 (%p34_p5), 1, %s2689_s20  }
  0x12   : > { %s2243_s6 = sshll.u32 (%p34_p5), %s2693_s21, 6  ;;  %s2504_s7 = smul.u32 (%p34_p5), 192, %s185_s30 }
  0x13   : > { %s2782_s10 = scalar_lea.vmem (%p34_p5), %s3143_s0, %s2243_s6 }
  0x14   : > { %v207_v0 = vld [vmem:[%s2782_s10] sm:$0xff] (%p34_p5)   ;;  %v211_v1 = vld [vmem:[%s2782_s10 + $0x8] sm:$0xff] (%p34_p5)   ;;  %v215_v2 = vld [vmem:[%s2782_s10 + $0x10] sm:$0xff] (%p34_p5)   ;;  %s2790_s11 = scalar_lea.vmem (%p34_p5), [#allocation3], %s2504_s7 }
  0x15   : > { %v219_v3 = vld [vmem:[%s2782_s10 + $0x18] sm:$0xff] (%p34_p5)   ;;  %v223_v4 = vld [vmem:[%s2782_s10 + $0x20] sm:$0xff] (%p34_p5)   ;;  %v227_v5 = vld [vmem:[%s2782_s10 + $0x28] sm:$0xff] (%p34_p5)   ;;  %208 = vst [vmem:[%s2790_s11] sm:$0xff] (%p34_p5), %v207_v0  }
  0x16   : > { %212 = vst [vmem:[%s2790_s11 + $0x8] sm:$0xff] %v211_v1   ;;  %216 = vst [vmem:[%s2790_s11 + $0x10] sm:$0xff] %v215_v2   ;;  %v231_v6 = vld [vmem:[%s2782_s10 + $0x30] sm:$0xff]   ;;  %v235_v7 = vld [vmem:[%s2782_s10 + $0x38] sm:$0xff]  }
  0x17   : > { %220 = vst [vmem:[%s2790_s11 + $0x18] sm:$0xff] %v219_v3   ;;  %224 = vst [vmem:[%s2790_s11 + $0x20] sm:$0xff] %v223_v4   ;;  %v239_v8 = vld [vmem:[%s2782_s10 + $0x80] sm:$0xff]   ;;  %v243_v9 = vld [vmem:[%s2782_s10 + $0x88] sm:$0xff]  }
  0x18   : > { %228 = vst [vmem:[%s2790_s11 + $0x28] sm:$0xff] %v227_v5   ;;  %232 = vst [vmem:[%s2790_s11 + $0x30] sm:$0xff] %v231_v6   ;;  %v247_v10 = vld [vmem:[%s2782_s10 + $0x90] sm:$0xff]   ;;  %v251_v11 = vld [vmem:[%s2782_s10 + $0x98] sm:$0xff]  }
  0x19   : > { %236 = vst [vmem:[%s2790_s11 + $0x38] sm:$0xff] %v235_v7   ;;  %240 = vst [vmem:[%s2790_s11 + $0x40] sm:$0xff] %v239_v8   ;;  %v255_v12 = vld [vmem:[%s2782_s10 + $0xa0] sm:$0xff]   ;;  %v259_v13 = vld [vmem:[%s2782_s10 + $0xa8] sm:$0xff]  }
  0x1a   : > { %244 = vst [vmem:[%s2790_s11 + $0x48] sm:$0xff] %v243_v9   ;;  %248 = vst [vmem:[%s2790_s11 + $0x50] sm:$0xff] %v247_v10   ;;  %v263_v14 = vld [vmem:[%s2782_s10 + $0xb0] sm:$0xff]   ;;  %v267_v15 = vld [vmem:[%s2782_s10 + $0xb8] sm:$0xff]  }
  0x1b   : > { %252 = vst [vmem:[%s2790_s11 + $0x58] sm:$0xff] %v251_v11   ;;  %256 = vst [vmem:[%s2790_s11 + $0x60] sm:$0xff] %v255_v12   ;;  %v271_v16 = vld [vmem:[%s2782_s10 + $0x100] sm:$0xff]   ;;  %v275_v17 = vld [vmem:[%s2782_s10 + $0x108] sm:$0xff]  }
  0x1c   : > { %260 = vst [vmem:[%s2790_s11 + $0x68] sm:$0xff] %v259_v13   ;;  %264 = vst [vmem:[%s2790_s11 + $0x70] sm:$0xff] %v263_v14   ;;  %v279_v18 = vld [vmem:[%s2782_s10 + $0x110] sm:$0xff]   ;;  %v283_v19 = vld [vmem:[%s2782_s10 + $0x118] sm:$0xff]  }
  0x1d   : > { %268 = vst [vmem:[%s2790_s11 + $0x78] sm:$0xff] %v267_v15   ;;  %272 = vst [vmem:[%s2790_s11 + $0x80] sm:$0xff] %v271_v16   ;;  %v287_v20 = vld [vmem:[%s2782_s10 + $0x120] sm:$0xff]   ;;  %v291_v21 = vld [vmem:[%s2782_s10 + $0x128] sm:$0xff]  }
  0x1e   : > { %276 = vst [vmem:[%s2790_s11 + $0x88] sm:$0xff] %v275_v17   ;;  %280 = vst [vmem:[%s2790_s11 + $0x90] sm:$0xff] %v279_v18   ;;  %v295_v22 = vld [vmem:[%s2782_s10 + $0x130] sm:$0xff]   ;;  %v299_v23 = vld [vmem:[%s2782_s10 + $0x138] sm:$0xff]  }
  0x1f   : > { %284 = vst [vmem:[%s2790_s11 + $0x98] sm:$0xff] %v283_v19   ;;  %288 = vst [vmem:[%s2790_s11 + $0xa0] sm:$0xff] %v287_v20  }
  0x20   : > { %292 = vst [vmem:[%s2790_s11 + $0xa8] sm:$0xff] %v291_v21   ;;  %296 = vst [vmem:[%s2790_s11 + $0xb0] sm:$0xff] %v295_v22  }
  0x21   : > { %300 = vst [vmem:[%s2790_s11 + $0xb8] sm:$0xff] %v299_v23  }
  0x22 PF: > { %p2033_p10 = scmp.ge.s32.totalorder %s2693_s21, 1  ;;  %p421_p11 = scmp.lt.s32.totalorder %s2693_s21, 3 }
  0x24   : > { %p422_p12 = pnand %p2033_p10, %p421_p11 }
  0x25   : > { %s2840_s14 = sand.u32 (!%p422_p12), 1, %s2685_s19  }
  0x26   : > { %425 = sbr.rel (%p422_p12) target bundleno = 545 (0x221), region = 77  ;;  %s2034_s12 = sshll.u32 (!%p422_p12), %s2840_s14, 7 }
  0x27   : > { %s2505_s17 = smul.u32 (!%p422_p12), 192, %s2840_s14  ;;  %s3060_s16 = scalar_lea.vmem (!%p422_p12), [#allocation4], %s2034_s12 }
  0x28   : > { %s1960_s23 = sshll.u32 (!%p422_p12), %s3060_s16, 4  ;;  %s3099_s23 = int_to_ptr.vmem [resolvable:$true] %s1960_s23 }
  0x29   : > { %s2858_s10 = scalar_lea.vmem (!%p422_p12), [#allocation3], %s2505_s17  ;;  %s2292_s17 = sshll.u32 (!%p422_p12), %s2027_s22, 11 }
  0x2a   : > { %s3097_s30 = scalar_lea.hbm (!%p422_p12), %s3148_s5, %s2292_s17  ;;  %s2633_s6 = scalar_lea.vmem (!%p422_p12), %s3099_s23, 2048 }
  0x2b   : > { %v2547_v24 = vld [vmem:[%s3144_s1 + $0x10] sm:$0xff]   ;;  %v2548_v25 = vld [vmem:[%s3144_s1 + $0x28] sm:$0xff]   ;;  %v2550_v27 = vld [vmem:[%s3144_s1 + $0x20] sm:$0xff]   ;;  %vm545_vm0 = vcmask 392192   ;;  %p2634_p13 = scmp.ne.s32.totalorder %s3099_s23, %s2633_s6  ;;  %s2695_s22 = smov [#allocation4]  }
  0x2c   : > { %2406 = vmatprep.subr.bf16.mxu0 %v2547_v24  ;;  %v2549_v26 = vld [vmem:[%s3144_s1 + $0x8] sm:$0xff]   ;;  %2428 = vmatprep.subr.bf16.mxu1 %v2548_v25  ;;  %v2551_v28 = vld [vmem:[%s3144_s1] sm:$0xff]   ;;  %v2552_v29 = vld [vmem:[%s3144_s1 + $0x18] sm:$0xff]   ;;  %s2637_s7 = sshll.u32 %s2695_s22, 4  ;;  %s2638_s7 = int_to_ptr.vmem [resolvable:$false] %s2637_s7 }
  0x2d   : > { %2407 = vmatpush3.bf16.msra.mxu0 %v2547_v24  ;;  %2429 = vmatpush3.bf16.msra.mxu1 %v2548_v25  ;;  %v2553_v30 = vld [vmem:[%s2858_s10] sm:$0xff]   ;;  %v2555_v32 = vld [vmem:[%s2858_s10 + $0x8] sm:$0xff]   ;;  %v2558_v35 = vld [vmem:[%s2858_s10 + $0x10] sm:$0xff]   ;;  %p2635_p0 = pnand %p2634_p13, %p2766_p6  ;;  %s2639_s8 = scalar_lea.vmem %s2638_s7, 4096 }
  0x2e   : > { %2408 = vmatprep.subr.bf16.mxu0 %v2549_v26  ;;  %2430 = vmatprep.subr.bf16.mxu1 %v2550_v27  ;;  %v2554_v31 = vld [vmem:[%s2858_s10 + $0x40] sm:$0xff]   ;;  %v2556_v33 = vld [vmem:[%s2858_s10 + $0x48] sm:$0xff]   ;;  %v2559_v36 = vld [vmem:[%s2858_s10 + $0x50] sm:$0xff]   ;;  %p2640_p2 = scmp.lt.s32.totalorder %s3099_s23, %s2638_s7  ;;  %p2641_p3 = scmp.lt.s32.totalorder %s2639_s8, %s2633_s6 }
  0x2f   : > { %2412 = vmatprep.mubr.msk.bf16.mxu0 %vm545_vm0, %v2553_v30  ;;  %2434 = vmatprep.mubr.msk.bf16.mxu1 %vm545_vm0, %v2554_v31  ;;  %v2557_v34 = vld [vmem:[%s3144_s1 + $0x40] sm:$0xff]   ;;  %v2562_v37 = vld [vmem:[%s3144_s1 + $0x38] sm:$0xff]   ;;  %v2571_v42 = vld [vmem:[%s3144_s1 + $0x30] sm:$0xff]   ;;  %p2636_p1 = pneg %p2635_p0 }
  0x30   : > { %v2560_v38 = vld [vmem:[%s2858_s10 + $0x18] sm:$0xff]   ;;  %v2563_v40 = vld [vmem:[%s2858_s10 + $0x20] sm:$0xff]   ;;  %v2565_v43 = vld [vmem:[%s2858_s10 + $0x28] sm:$0xff]   ;;  %p2642_p4 = por %p2641_p3, %p2640_p2 }
  0x31   : > { %2409 = vmatpush3.bf16.msra.mxu0 %v2549_v26  ;;  %2431 = vmatpush3.bf16.msra.mxu1 %v2550_v27  ;;  %v2561_v39 = vld [vmem:[%s2858_s10 + $0x58] sm:$0xff]   ;;  %v2564_v41 = vld [vmem:[%s2858_s10 + $0x60] sm:$0xff]   ;;  %v2566_v44 = vld [vmem:[%s2858_s10 + $0x68] sm:$0xff]  }
  0x32   : > { %2410 = vmatprep.subr.bf16.mxu0 %v2551_v28  ;;  %2432 = vmatprep.subr.bf16.mxu1 %v2552_v29  ;;  %v2567_v45 = vld [vmem:[%s2858_s10 + $0x30] sm:$0xff]   ;;  %v2569_v47 = vld [vmem:[%s2858_s10 + $0x38] sm:$0xff]   ;;  %v2572_v49 = vld [vmem:[%s2858_s10 + $0x80] sm:$0xff]   ;;  %p2643_p5 = pnand %p2642_p4, %p2636_p1 }
  0x33   : > { %v2568_v46 = vld [vmem:[%s2858_s10 + $0x70] sm:$0xff]   ;;  %v2570_v48 = vld [vmem:[%s2858_s10 + $0x78] sm:$0xff]   ;;  %v2584_v54 = vld [vmem:[%s3146_s3 + $0x68] sm:$0xff]  }
  0x34   : > { %v2580_v50 = vld [vmem:[%s3146_s3 + $0x78] sm:$0xff]   ;;  %v2582_v52 = vld [vmem:[%s3146_s3 + $0x70] sm:$0xff]   ;;  %v2573_v55 = vld [vmem:[%s2858_s10 + $0x88] sm:$0xff]  }
  0x35   : > { %2411 = vmatpush3.bf16.msra.mxu0 %v2551_v28  ;;  %2433 = vmatpush3.bf16.msra.mxu1 %v2552_v29  ;;  %v2581_v51 = vld [vmem:[%s3146_s3 + $0x38] sm:$0xff]   ;;  %v2583_v53 = vld [vmem:[%s3146_s3 + $0x30] sm:$0xff]   ;;  %v2576_v58 = vld [vmem:[%s2858_s10 + $0xa0] sm:$0xff]  }
  0x36   : > { %2450 = vmatprep.subr.bf16.mxu0 %v2557_v34  ;;  %2326 = vmatprep.subr.bf16.mxu1 %v2580_v50  ;;  %v2574_v56 = vld [vmem:[%s2858_s10 + $0x90] sm:$0xff]   ;;  %v2575_v57 = vld [vmem:[%s2858_s10 + $0x98] sm:$0xff]   ;;  %v2577_v59 = vld [vmem:[%s2858_s10 + $0xa8] sm:$0xff]  }
  0x37   : > { %v2578_v60 = vld [vmem:[%s2858_s10 + $0xb0] sm:$0xff]   ;;  %v2579_v61 = vld [vmem:[%s2858_s10 + $0xb8] sm:$0xff]   ;;  %v2585_v62 = vld [vmem:[%s3146_s3 + $0x28] sm:$0xff]   ;;  %s1947_s10 = scalar_lea.sflag [#allocation5], %s2840_s14 }
  0x38   : > { %2413 = vmatmul.mubr.msk.bf16.vlgmr.msra.gmra.mxu0 %vm545_vm0, %v2555_v32  ;;  %2435 = vmatmul.mubr.msk.bf16.vlgmr.msra.gmra.mxu1 %vm545_vm0, %v2556_v33  ;;  %v2586_v63 = vld [vmem:[%s3146_s3 + $0x60] sm:$0xff]   ;;  %v2588_v1 = vld [vmem:[%s3146_s3 + $0x58] sm:$0xff]   ;;  %v2590_v3 = vld [vmem:[%s3146_s3 + $0x50] sm:$0xff]  }
  0x39   : > { %2451 = vmatpush3.bf16.msra.mxu0 %v2557_v34  ;;  %2416 = vmatprep.mubr.msk.bf16.mxu0 %vm545_vm0, %v2558_v35  ;;  %v2587_v0 = vld [vmem:[%s3146_s3 + $0x20] sm:$0xff]   ;;  %v2589_v2 = vld [vmem:[%s3146_s3 + $0x18] sm:$0xff]   ;;  %v2591_v4 = vld [vmem:[%s3146_s3 + $0x10] sm:$0xff]  }
  0x3a   : > { %2438 = vmatprep.mubr.msk.bf16.mxu1 %vm545_vm0, %v2559_v36  ;;  %2452 = vmatprep.subr.bf16.mxu0 %v2562_v37  ;;  %v2592_v5 = vld [vmem:[%s3146_s3 + $0x48] sm:$0xff]   ;;  %v2594_v7 = vld [vmem:[%s3146_s3 + $0x40] sm:$0xff]   ;;  %v2599_v9 = vld [vmem:[%s3146_s3 + $0xb8] sm:$0xff]  }
  0x3b   : > { %2327 = vmatpush3.bf16.msra.mxu1 %v2581_v51  ;;  %v2593_v6 = vld [vmem:[%s3146_s3 + $0x8] sm:$0xff]   ;;  %v2595_v8 = vld [vmem:[%s3146_s3] sm:$0xff]   ;;  %v2602_v10 = vld [vmem:[%s3146_s3 + $0xb0] sm:$0xff]  }
  0x3c   : > { %2328 = vmatprep.subr.bf16.mxu1 %v2582_v52  ;;  %v2603_v11 = vld [vmem:[%s3146_s3 + $0xa8] sm:$0xff]   ;;  %v2606_v12 = vld [vmem:[%s3146_s3 + $0xa0] sm:$0xff]   ;;  %v2608_v13 = vld [vmem:[%s3146_s3 + $0x98] sm:$0xff]  }
  0x3d   : > { %2453 = vmatpush3.bf16.msra.mxu0 %v2562_v37  ;;  %v2611_v14 = vld [vmem:[%s3146_s3 + $0x90] sm:$0xff]   ;;  %v2612_v15 = vld [vmem:[%s3146_s3 + $0x88] sm:$0xff]   ;;  %v2615_v16 = vld [vmem:[%s3146_s3 + $0x80] sm:$0xff]  }
  0x3e   : > { %2454 = vmatprep.subr.bf16.mxu0 %v2571_v42  ;;  %v2992_v17 = vld [vmem:[%s3145_s2] ss:$0 sm:$0xff]  ;;  %v2997_v18 = vld [vmem:[%s3145_s2 + $0x1] ss:$0 sm:$0xff] }
  0x3f   : > { %2329 = vmatpush3.bf16.msra.mxu1 %v2583_v53 }
  0x40   : > { %2417 = vmatmul.mubr.msk.bf16.gmra.mxu0 %vm545_vm0, %v2560_v38  ;;  %2439 = vmatmul.mubr.msk.bf16.gmra.mxu1 %vm545_vm0, %v2561_v39 }
  0x41   : > { %2420 = vmatprep.mubr.msk.bf16.mxu0 %vm545_vm0, %v2563_v40  ;;  %2442 = vmatprep.mubr.msk.bf16.mxu1 %vm545_vm0, %v2564_v41 }
  0x42   : > { %2455 = vmatpush3.bf16.msra.mxu0 %v2571_v42  ;;  %2330 = vmatprep.subr.bf16.mxu1 %v2584_v54 }
  0x43   : > { %2331 = vmatpush3.bf16.msra.mxu1 %v2585_v62  ;;  %2472 = vmatprep.subr.bf16.mxu0 %v2599_v9 }
  0x44   : > { %2332 = vmatprep.subr.bf16.mxu1 %v2586_v63 }
  0x47   : > { %2333 = vmatpush3.bf16.msra.mxu1 %v2587_v0 }
  0x48   : > { %2421 = vmatmul.mubr.msk.bf16.gmra.mxu0 %vm545_vm0, %v2565_v43  ;;  %2443 = vmatmul.mubr.msk.bf16.gmra.mxu1 %vm545_vm0, %v2566_v44 }
  0x49   : > { %2424 = vmatprep.mubr.msk.bf16.mxu0 %vm545_vm0, %v2567_v45  ;;  %2446 = vmatprep.mubr.msk.bf16.mxu1 %vm545_vm0, %v2568_v46 }
  0x4a   : > { %2334 = vmatprep.subr.bf16.mxu1 %v2588_v1 }
  0x4b   : > { %2335 = vmatpush3.bf16.msra.mxu1 %v2589_v2 }
  0x4c   : > { %2336 = vmatprep.subr.bf16.mxu1 %v2590_v3 }
  0x4f   : > { %2337 = vmatpush3.bf16.msra.mxu1 %v2591_v4 }
  0x50   : > { %2425 = vmatmul.mubr.msk.bf16.gmra.mxu0 %vm545_vm0, %v2569_v47  ;;  %2447 = vmatmul.mubr.msk.bf16.gmra.mxu1 %vm545_vm0, %v2570_v48 }
  0x51   : > { %2456 = vmatprep.mubr.msk.bf16.mxu0 %vm545_vm0, %v2572_v49  ;;  %2338 = vmatprep.subr.bf16.mxu1 %v2592_v5 }
  0x53   : > { %2339 = vmatpush3.bf16.msra.mxu1 %v2593_v6 }
  0x54   : > { %2340 = vmatprep.subr.bf16.mxu1 %v2594_v7 }
  0x57   : > { %2341 = vmatpush3.bf16.msra.mxu1 %v2595_v8 }
  0x58   : > { %2457 = vmatmul.mubr.msk.bf16.vlgmr.msra.gmra.mxu0 %vm545_vm0, %v2573_v55 }
  0x59   : > { %2460 = vmatprep.mubr.msk.bf16.mxu0 %vm545_vm0, %v2574_v56  ;;  %2473 = vmatpush3.bf16.msra.mxu0 %v2599_v9 }
  0x5a   : > { %2474 = vmatprep.subr.bf16.mxu0 %v2602_v10 }
  0x5d   : > { %2475 = vmatpush3.bf16.msra.mxu0 %v2602_v10 }
  0x5e   : > { %2476 = vmatprep.subr.bf16.mxu0 %v2603_v11 }
  0x60   : > { %2461 = vmatmul.mubr.msk.bf16.gmra.mxu0 %vm545_vm0, %v2575_v57 }
  0x61   : > { %2464 = vmatprep.mubr.msk.bf16.mxu0 %vm545_vm0, %v2576_v58  ;;  %2477 = vmatpush3.bf16.msra.mxu0 %v2603_v11 }
  0x62   : > { %2478 = vmatprep.subr.bf16.mxu0 %v2606_v12 }
  0x65   : > { %2479 = vmatpush3.bf16.msra.mxu0 %v2606_v12 }
  0x66   : > { %2480 = vmatprep.subr.bf16.mxu0 %v2608_v13 }
  0x68   : > { %2465 = vmatmul.mubr.msk.bf16.gmra.mxu0 %vm545_vm0, %v2577_v59 }
  0x69   : > { %2468 = vmatprep.mubr.msk.bf16.mxu0 %vm545_vm0, %v2578_v60  ;;  %2481 = vmatpush3.bf16.msra.mxu0 %v2608_v13 }
  0x6a   : > { %2482 = vmatprep.subr.bf16.mxu0 %v2611_v14 }
  0x6d   : > { %2483 = vmatpush3.bf16.msra.mxu0 %v2611_v14 }
  0x6e   : > { %2484 = vmatprep.subr.bf16.mxu0 %v2612_v15 }
  0x70   : > { %2469 = vmatmul.mubr.msk.bf16.gmra.mxu0 %vm545_vm0, %v2579_v61 }
  0x71   : > { %2485 = vmatpush3.bf16.msra.mxu0 %v2612_v15 }
  0x72   : > { %2486 = vmatprep.subr.bf16.mxu0 %v2615_v16 }
  0x75   : > { %2487 = vmatpush3.bf16.msra.mxu0 %v2615_v16 }
  0xf8   : > { %v2414_v19 = vpop.f32.mrf.mxu0  ;;  %v2436_v21 = vpop.f32.mrf.mxu1 }
  0xf9   : > { %v613_v20 = vadd.f32 %v2414_v19, %v2992_v17  ;;  %v920_v22 = vadd.f32 %v2436_v21, %v2997_v18 }
  0xfa   : > { %v604_v23 = vpop.f32.mrf.mxu0  ;;  %v911_v26 = vpop.f32.mrf.mxu1 }
  0xfb   : > { %v669_v24 = vmax.f32 %v613_v20, 0.0  ;;  %v605_v25 = vadd.f32 %v2992_v17, %v604_v23  ;;  %v976_v27 = vmax.f32 %v920_v22, 0.0  ;;  %v912_v28 = vadd.f32 %v2997_v18, %v911_v26 }
  0xfc   : > { %v2415_v29 = vpop.f32.mrf.mxu0  ;;  %v2437_v33 = vpop.f32.mrf.mxu1 }
  0xfd   : > { %v2246_v30 = vpack.c.bf16 %v669_v24, %v669_v24  ;;  %v667_v31 = vmax.f32 %v605_v25, 0.0  ;;  %v616_v32 = vadd.f32 %v2415_v29, %v2992_v17  ;;  %v2262_v34 = vpack.c.bf16 %v976_v27, %v976_v27 }
  0xfe   : > { %v974_v35 = vmax.f32 %v912_v28, 0.0  ;;  %v923_v36 = vadd.f32 %v2437_v33, %v2997_v18  ;;  %v607_v37 = vpop.f32.mrf.mxu0  ;;  %v914_v41 = vpop.f32.mrf.mxu1 }
  0xff   : > { %749 = vst [vmem:[#allocation2 + $0x18] sm:$0xf] %v2246_v30  ;;  %v2244_v38 = vpack.c.bf16 %v667_v31, %v667_v31  ;;  %v670_v39 = vmax.f32 %v616_v32, 0.0  ;;  %v608_v40 = vadd.f32 %v2992_v17, %v607_v37  ;;  %1056 = vst [vmem:[#allocation2 + $0x1c] sm:$0xf] %v2262_v34  ;;  %v915_v44 = vadd.f32 %v2997_v18, %v914_v41 }
 0x100   : > { %v2260_v42 = vpack.c.bf16 %v974_v35, %v974_v35  ;;  %v977_v43 = vmax.f32 %v923_v36, 0.0  ;;  %v2418_v45 = vpop.f32.mrf.mxu0  ;;  %v2440_v49 = vpop.f32.mrf.mxu1 }
 0x101   : > { %747 = vst [vmem:[#allocation2] sm:$0xf] %v2244_v38  ;;  %v2247_v46 = vpack.c.bf16 %v670_v39, %v670_v39  ;;  %v668_v47 = vmax.f32 %v608_v40, 0.0  ;;  %v629_v48 = vadd.f32 %v2418_v45, %v2992_v17  ;;  %v975_v51 = vmax.f32 %v915_v44, 0.0 }
 0x102   : > { %1054 = vst [vmem:[#allocation2 + $0x4] sm:$0xf] %v2260_v42  ;;  %v2263_v50 = vpack.c.bf16 %v977_v43, %v977_v43  ;;  %v936_v52 = vadd.f32 %v2440_v49, %v2997_v18  ;;  %v620_v53 = vpop.f32.mrf.mxu0  ;;  %v927_v57 = vpop.f32.mrf.mxu1 }
 0x103   : > { %750 = vst [vmem:[#allocation2 + $0x24] sm:$0xf] %v2247_v46  ;;  %v2245_v54 = vpack.c.bf16 %v668_v47, %v668_v47  ;;  %v673_v55 = vmax.f32 %v629_v48, 0.0  ;;  %v621_v56 = vadd.f32 %v2992_v17, %v620_v53  ;;  %v2261_v58 = vpack.c.bf16 %v975_v51, %v975_v51 }
 0x104   : > { %1057 = vst [vmem:[#allocation2 + $0x28] sm:$0xf] %v2263_v50  ;;  %v980_v59 = vmax.f32 %v936_v52, 0.0  ;;  %v928_v60 = vadd.f32 %v2997_v18, %v927_v57  ;;  %v2419_v61 = vpop.f32.mrf.mxu0  ;;  %v2441_v1 = vpop.f32.mrf.mxu1 }
 0x105   : > { %748 = vst [vmem:[#allocation2 + $0xc] sm:$0xf] %v2245_v54  ;;  %v2250_v62 = vpack.c.bf16 %v673_v55, %v673_v55  ;;  %v671_v63 = vmax.f32 %v621_v56, 0.0  ;;  %v632_v0 = vadd.f32 %v2419_v61, %v2992_v17  ;;  %1055 = vst [vmem:[#allocation2 + $0x10] sm:$0xf] %v2261_v58  ;;  %v939_v4 = vadd.f32 %v2441_v1, %v2997_v18 }
 0x106   : > { %v2266_v2 = vpack.c.bf16 %v980_v59, %v980_v59  ;;  %v978_v3 = vmax.f32 %v928_v60, 0.0  ;;  %v623_v5 = vpop.f32.mrf.mxu0  ;;  %v930_v9 = vpop.f32.mrf.mxu1 }
 0x107   : > { %753 = vst [vmem:[#allocation2 + $0x48] sm:$0xf] %v2250_v62  ;;  %v2248_v6 = vpack.c.bf16 %v671_v63, %v671_v63  ;;  %v674_v7 = vmax.f32 %v632_v0, 0.0  ;;  %v624_v8 = vadd.f32 %v2992_v17, %v623_v5  ;;  %v981_v11 = vmax.f32 %v939_v4, 0.0  ;;  %v1381_v5 = vld [vmem:[#allocation2 + $0x18] sm:$0xff] }
 0x108   : > { %1060 = vst [vmem:[#allocation2 + $0x4c] sm:$0xf] %v2266_v2  ;;  %v2264_v10 = vpack.c.bf16 %v978_v3, %v978_v3  ;;  %v931_v12 = vadd.f32 %v2997_v18, %v930_v9  ;;  %v2422_v13 = vpop.f32.mrf.mxu0  ;;  %v2444_v19 = vpop.f32.mrf.mxu1 }
 0x109   : > { %751 = vst [vmem:[#allocation2 + $0x30] sm:$0xf] %v2248_v6  ;;  %v2251_v14 = vpack.c.bf16 %v674_v7, %v674_v7  ;;  %v672_v15 = vmax.f32 %v624_v8, 0.0  ;;  %v645_v16 = vadd.f32 %v2422_v13, %v2992_v17  ;;  %v2267_v20 = vpack.c.bf16 %v981_v11, %v981_v11  ;;  %v3032_v13 = vld [vmem:[%s3145_s2 + $0x2] ss:$0 sm:$0xff] }
 0x10a   : > { %1058 = vst [vmem:[#allocation2 + $0x34] sm:$0xf] %v2264_v10  ;;  %v979_v21 = vmax.f32 %v931_v12, 0.0  ;;  %v952_v22 = vadd.f32 %v2444_v19, %v2997_v18  ;;  %v636_v23 = vpop.f32.mrf.mxu0  ;;  %v943_v27 = vpop.f32.mrf.mxu1 }
 0x10b   : > { %754 = vst [vmem:[#allocation2 + $0x54] sm:$0xf] %v2251_v14  ;;  %v2249_v24 = vpack.c.bf16 %v672_v15, %v672_v15  ;;  %v677_v25 = vmax.f32 %v645_v16, 0.0  ;;  %v637_v26 = vadd.f32 %v2992_v17, %v636_v23  ;;  %1061 = vst [vmem:[#allocation2 + $0x58] sm:$0xf] %v2267_v20  ;;  %v944_v30 = vadd.f32 %v2997_v18, %v943_v27  ;;  %v1383_v61 = vld [vmem:[#allocation2 + $0x24] sm:$0xff] }
 0x10c   : > { %v2265_v28 = vpack.c.bf16 %v979_v21, %v979_v21  ;;  %v984_v29 = vmax.f32 %v952_v22, 0.0  ;;  %v2423_v31 = vpop.f32.mrf.mxu0  ;;  %v2445_v35 = vpop.f32.mrf.mxu1  ;;  %v2596_v36 = vld [vmem:[#allocation2] ss:$12 sps:$4 sm:$0xff]   ;;  %v2598_v37 = vld [vmem:[#allocation2 + $0x4] ss:$12 sps:$4 sm:$0xff]   ;;  %v2193_v14 = vcombine.low %v1381_v5, %v1383_v61 }
 0x10d   : > { %752 = vst [vmem:[#allocation2 + $0x3c] sm:$0xf] %v2249_v24  ;;  %v2254_v32 = vpack.c.bf16 %v677_v25, %v677_v25  ;;  %v675_v33 = vmax.f32 %v637_v26, 0.0  ;;  %v648_v34 = vadd.f32 %v2423_v31, %v2992_v17  ;;  %v982_v39 = vmax.f32 %v944_v30, 0.0  ;;  %1768 = vmatprep.mubr.bf16.mxu1 %v2598_v37  ;;  %v2600_v46 = vld [vmem:[#allocation2 + $0x1c] ss:$12 sps:$4 sm:$0xff]  }
 0x10e   : > { %1059 = vst [vmem:[#allocation2 + $0x40] sm:$0xf] %v2265_v28  ;;  %v2270_v38 = vpack.c.bf16 %v984_v29, %v984_v29  ;;  %v955_v40 = vadd.f32 %v2445_v35, %v2997_v18  ;;  %v639_v41 = vpop.f32.mrf.mxu0  ;;  %v946_v45 = vpop.f32.mrf.mxu1  ;;  %1769 = vmatmul.mubr.bf16.vlgmr.msra.gmra.mxu1 %v2596_v36 }
 0x10f   : > { %757 = vst [vmem:[#allocation2 + $0x78] sm:$0xf] %v2254_v32  ;;  %v2252_v42 = vpack.c.bf16 %v675_v33, %v675_v33  ;;  %v678_v43 = vmax.f32 %v648_v34, 0.0  ;;  %v640_v44 = vadd.f32 %v2992_v17, %v639_v41  ;;  %v2268_v47 = vpack.c.bf16 %v982_v39, %v982_v39  ;;  %1776 = vmatprep.mubr.bf16.mxu1 %v2600_v46 }
 0x110   : > { %1064 = vst [vmem:[#allocation2 + $0x7c] sm:$0xf] %v2270_v38  ;;  %v985_v48 = vmax.f32 %v955_v40, 0.0  ;;  %v947_v49 = vadd.f32 %v2997_v18, %v946_v45  ;;  %v2426_v50 = vpop.f32.mrf.mxu0  ;;  %v2448_v54 = vpop.f32.mrf.mxu1 }
 0x111   : > { %755 = vst [vmem:[#allocation2 + $0x60] sm:$0xf] %v2252_v42  ;;  %v2255_v51 = vpack.c.bf16 %v678_v43, %v678_v43  ;;  %v676_v52 = vmax.f32 %v640_v44, 0.0  ;;  %v661_v53 = vadd.f32 %v2426_v50, %v2992_v17  ;;  %1062 = vst [vmem:[#allocation2 + $0x64] sm:$0xf] %v2268_v47  ;;  %v968_v57 = vadd.f32 %v2448_v54, %v2997_v18 }
 0x112   : > { %v2271_v55 = vpack.c.bf16 %v985_v48, %v985_v48  ;;  %v983_v56 = vmax.f32 %v947_v49, 0.0  ;;  %v652_v58 = vpop.f32.mrf.mxu0  ;;  %v959_v63 = vpop.f32.mrf.mxu1  ;;  %v2609_v43 = vld [vmem:[#allocation2 + $0x4c] ss:$12 sps:$4 sm:$0xff]  }
 0x113   : > { %758 = vst [vmem:[#allocation2 + $0x84] sm:$0xf] %v2255_v51  ;;  %v2253_v59 = vpack.c.bf16 %v676_v52, %v676_v52  ;;  %v681_v60 = vmax.f32 %v661_v53, 0.0  ;;  %v653_v62 = vadd.f32 %v2992_v17, %v652_v58  ;;  %v988_v1 = vmax.f32 %v968_v57, 0.0  ;;  %v1389_v51 = vld [vmem:[#allocation2 + $0x48] sm:$0xff]  ;;  %v1391_v52 = vld [vmem:[#allocation2 + $0x54] sm:$0xff] }
 0x114   : > { %1065 = vst [vmem:[#allocation2 + $0x88] sm:$0xf] %v2271_v55  ;;  %v2269_v0 = vpack.c.bf16 %v983_v56, %v983_v56  ;;  %v960_v2 = vadd.f32 %v2997_v18, %v959_v63  ;;  %v2427_v3 = vpop.f32.mrf.mxu0  ;;  %v2449_v8 = vpop.f32.mrf.mxu1  ;;  %v2607_v39 = vld [vmem:[#allocation2 + $0x30] ss:$12 sps:$4 sm:$0xff]  }
 0x115   : > { %756 = vst [vmem:[#allocation2 + $0x6c] sm:$0xf] %v2253_v59  ;;  %v2258_v4 = vpack.c.bf16 %v681_v60, %v681_v60  ;;  %v679_v6 = vmax.f32 %v653_v62, 0.0  ;;  %v664_v7 = vadd.f32 %v2427_v3, %v2992_v17  ;;  %v2274_v9 = vpack.c.bf16 %v988_v1, %v988_v1  ;;  %v2604_v21 = vld [vmem:[#allocation2 + $0x34] ss:$12 sps:$4 sm:$0xff]  }
 0x116   : > { %1063 = vst [vmem:[#allocation2 + $0x70] sm:$0xf] %v2269_v0  ;;  %v986_v10 = vmax.f32 %v960_v2, 0.0  ;;  %v971_v11 = vadd.f32 %v2449_v8, %v2997_v18  ;;  %v655_v12 = vpop.f32.mrf.mxu0  ;;  %v962_v20 = vpop.f32.mrf.mxu1  ;;  %1777 = vmatmul.mubr.bf16.gmra.mxu1 %v2193_v14  ;;  %v2199_v59 = vcombine.low %v1389_v51, %v1391_v52 }
 0x117   : > { %761 = vst [vmem:[#allocation2 + $0xa8] sm:$0xf] %v2258_v4  ;;  %v2256_v15 = vpack.c.bf16 %v679_v6, %v679_v6  ;;  %v682_v16 = vmax.f32 %v664_v7, 0.0  ;;  %v656_v19 = vadd.f32 %v2992_v17, %v655_v12  ;;  %1068 = vst [vmem:[#allocation2 + $0xac] sm:$0xf] %v2274_v9  ;;  %v963_v24 = vadd.f32 %v2997_v18, %v962_v20 }
 0x118   : > { %v2272_v22 = vpack.c.bf16 %v986_v10, %v986_v10  ;;  %v989_v23 = vmax.f32 %v971_v11, 0.0  ;;  %v2458_v25 = vpop.f32.mrf.mxu0  ;;  %1784 = vmatprep.mubr.bf16.mxu1 %v2604_v21  ;;  %v1393_v12 = vld [vmem:[#allocation2 + $0x60] sm:$0xff] }
 0x119   : > { %759 = vst [vmem:[#allocation2 + $0x90] sm:$0xf] %v2256_v15  ;;  %v2259_v26 = vpack.c.bf16 %v682_v16, %v682_v16  ;;  %v680_v27 = vmax.f32 %v656_v19, 0.0  ;;  %v1227_v28 = vadd.f32 %v2458_v25, %v3032_v13  ;;  %v987_v30 = vmax.f32 %v963_v24, 0.0 }
 0x11a   : > { %1066 = vst [vmem:[#allocation2 + $0x94] sm:$0xf] %v2272_v22  ;;  %v2275_v29 = vpack.c.bf16 %v989_v23, %v989_v23  ;;  %v1218_v31 = vpop.f32.mrf.mxu0 }
 0x11b   : > { %762 = vst [vmem:[#allocation2 + $0xb4] sm:$0xf] %v2259_v26  ;;  %v2257_v17 = vpack.c.bf16 %v680_v27, %v680_v27  ;;  %v1283_v32 = vmax.f32 %v1227_v28, 0.0  ;;  %v1219_v33 = vadd.f32 %v3032_v13, %v1218_v31  ;;  %v2273_v34 = vpack.c.bf16 %v987_v30, %v987_v30  ;;  %v2618_v24 = vld [vmem:[#allocation2 + $0x7c] ss:$12 sps:$4 sm:$0xff]  }
 0x11c   : > { %1069 = vst [vmem:[#allocation2 + $0xb8] sm:$0xf] %v2275_v29  ;;  %v2459_v18 = vpop.f32.mrf.mxu0 }
 0x11d   : > { %760 = vst [vmem:[#allocation2 + $0x9c] sm:$0xf] %v2257_v17  ;;  %v2278_v35 = vpack.c.bf16 %v1283_v32, %v1283_v32  ;;  %v1281_v36 = vmax.f32 %v1219_v33, 0.0  ;;  %v1230_v37 = vadd.f32 %v2459_v18, %v3032_v13  ;;  %1067 = vst [vmem:[#allocation2 + $0xa0] sm:$0xf] %v2273_v34  ;;  %v1395_v7 = vld [vmem:[#allocation2 + $0x6c] sm:$0xff] }
 0x11e   : > { %v1221_v38 = vpop.f32.mrf.mxu0  ;;  %1785 = vmatmul.mubr.bf16.gmra.mxu1 %v2607_v39  ;;  %v2613_v63 = vld [vmem:[#allocation2 + $0x64] ss:$12 sps:$4 sm:$0xff]   ;;  %v2202_v20 = vcombine.low %v1393_v12, %v1395_v7 }
 0x11f   : > { %1363 = vst [vmem:[#allocation2 + $0x20] sm:$0xf] %v2278_v35  ;;  %v2276_v40 = vpack.c.bf16 %v1281_v36, %v1281_v36  ;;  %v1284_v41 = vmax.f32 %v1230_v37, 0.0  ;;  %v1222_v42 = vadd.f32 %v3032_v13, %v1221_v38  ;;  %1792 = vmatprep.mubr.bf16.mxu1 %v2609_v43  ;;  %v2621_v38 = vld [vmem:[#allocation2 + $0x78] ss:$12 sps:$4 sm:$0xff]  }
 0x120   : > { %v2462_v44 = vpop.f32.mrf.mxu0 }
 0x121   : > { %1361 = vst [vmem:[#allocation2 + $0x8] sm:$0xf] %v2276_v40  ;;  %v2279_v45 = vpack.c.bf16 %v1284_v41, %v1284_v41  ;;  %v1282_v46 = vmax.f32 %v1222_v42, 0.0  ;;  %v1243_v47 = vadd.f32 %v2462_v44, %v3032_v13 }
 0x122   : > { %v1234_v48 = vpop.f32.mrf.mxu0  ;;  %v2631_v51 = vld [vmem:[#allocation2 + $0xa8] ss:$12 sps:$4 sm:$0xff]  }
 0x123   : > { %1364 = vst [vmem:[#allocation2 + $0x2c] sm:$0xf] %v2279_v45  ;;  %v2277_v49 = vpack.c.bf16 %v1282_v46, %v1282_v46  ;;  %v1287_v50 = vmax.f32 %v1243_v47, 0.0  ;;  %v1235_v53 = vadd.f32 %v3032_v13, %v1234_v48 }
 0x124   : > { %v2463_v54 = vpop.f32.mrf.mxu0  ;;  %v2623_v42 = vld [vmem:[#allocation2 + $0x94] ss:$12 sps:$4 sm:$0xff]   ;;  %v2626_v48 = vld [vmem:[#allocation2 + $0x90] ss:$12 sps:$4 sm:$0xff]  }
 0x125   : > { %1362 = vst [vmem:[#allocation2 + $0x14] sm:$0xf] %v2277_v49  ;;  %v2282_v55 = vpack.c.bf16 %v1287_v50, %v1287_v50  ;;  %v1285_v56 = vmax.f32 %v1235_v53, 0.0  ;;  %v1246_v57 = vadd.f32 %v2463_v54, %v3032_v13  ;;  %v2628_v49 = vld [vmem:[#allocation2 + $0xac] ss:$12 sps:$4 sm:$0xff]  }
 0x126   : > { %v1237_v58 = vpop.f32.mrf.mxu0  ;;  %1793 = vmatmul.mubr.bf16.gmra.mxu1 %v2199_v59 }
 0x127   : > { %1367 = vst [vmem:[#allocation2 + $0x50] sm:$0xf] %v2282_v55  ;;  %v2280_v60 = vpack.c.bf16 %v1285_v56, %v1285_v56  ;;  %v1288_v61 = vmax.f32 %v1246_v57, 0.0  ;;  %v1238_v62 = vadd.f32 %v3032_v13, %v1237_v58  ;;  %1800 = vmatprep.mubr.bf16.mxu1 %v2613_v63 }
 0x128   : > { %v2466_v0 = vpop.f32.mrf.mxu0 }
 0x129   : > { %1365 = vst [vmem:[#allocation2 + $0x38] sm:$0xf] %v2280_v60  ;;  %v2283_v1 = vpack.c.bf16 %v1288_v61, %v1288_v61  ;;  %v1286_v2 = vmax.f32 %v1238_v62, 0.0  ;;  %v1259_v3 = vadd.f32 %v2466_v0, %v3032_v13 }
 0x12a   : > { %v1250_v4 = vpop.f32.mrf.mxu0  ;;  %v2617_v16 = vld [vmem:[#allocation2 + $0x20] ss:$12 sps:$4 sm:$0xff]  }
 0x12b   : > { %1368 = vst [vmem:[#allocation2 + $0x5c] sm:$0xf] %v2283_v1  ;;  %v2281_v5 = vpack.c.bf16 %v1286_v2, %v1286_v2  ;;  %v1291_v6 = vmax.f32 %v1259_v3, 0.0  ;;  %v1251_v8 = vadd.f32 %v3032_v13, %v1250_v4 }
 0x12c   : > { %v2467_v9 = vpop.f32.mrf.mxu0  ;;  %v2616_v10 = vld [vmem:[#allocation2 + $0x8] ss:$12 sps:$4 sm:$0xff]  }
 0x12d   : > { %1366 = vst [vmem:[#allocation2 + $0x44] sm:$0xf] %v2281_v5  ;;  %v2286_v11 = vpack.c.bf16 %v1291_v6, %v1291_v6  ;;  %v1289_v14 = vmax.f32 %v1251_v8, 0.0  ;;  %v1262_v15 = vadd.f32 %v2467_v9, %v3032_v13  ;;  %2488 = vmatprep.mubr.bf16.mxu0 %v2616_v10  ;;  %v3056_v5 = vld [vmem:[%s3147_s4] ss:$0 sm:$0xff] }
 0x12e   : > { %v1253_v19 = vpop.f32.mrf.mxu0  ;;  %2489 = vmatmul.mubr.bf16.vlgmr.msra.gmra.mxu0 %v2617_v16  ;;  %1801 = vmatmul.mubr.bf16.gmra.mxu1 %v2202_v20 }
 0x12f   : > { %1371 = vst [vmem:[#allocation2 + $0x80] sm:$0xf] %v2286_v11  ;;  %v2284_v21 = vpack.c.bf16 %v1289_v14, %v1289_v14  ;;  %v1292_v22 = vmax.f32 %v1262_v15, 0.0  ;;  %v1254_v23 = vadd.f32 %v3032_v13, %v1253_v19  ;;  %1808 = vmatprep.mubr.bf16.mxu1 %v2618_v24 }
 0x130   : > { %v2470_v25 = vpop.f32.mrf.mxu0 }
 0x131   : > { %1369 = vst [vmem:[#allocation2 + $0x68] sm:$0xf] %v2284_v21  ;;  %v2287_v26 = vpack.c.bf16 %v1292_v22, %v1292_v22  ;;  %v1290_v27 = vmax.f32 %v1254_v23, 0.0  ;;  %v1275_v28 = vadd.f32 %v2470_v25, %v3032_v13 }
 0x132   : > { %v1266_v29 = vpop.f32.mrf.mxu0  ;;  %v2622_v36 = vld [vmem:[#allocation2 + $0x50] ss:$12 sps:$4 sm:$0xff]  }
 0x133   : > { %1372 = vst [vmem:[#allocation2 + $0x8c] sm:$0xf] %v2287_v26  ;;  %v2285_v30 = vpack.c.bf16 %v1290_v27, %v1290_v27  ;;  %v1295_v31 = vmax.f32 %v1275_v28, 0.0  ;;  %v1267_v17 = vadd.f32 %v3032_v13, %v1266_v29 }
 0x134   : > { %v2471_v32 = vpop.f32.mrf.mxu0  ;;  %v2620_v33 = vld [vmem:[#allocation2 + $0x38] ss:$12 sps:$4 sm:$0xff]  }
 0x135   : > { %1370 = vst [vmem:[#allocation2 + $0x74] sm:$0xf] %v2285_v30  ;;  %v2290_v34 = vpack.c.bf16 %v1295_v31, %v1295_v31  ;;  %v1293_v18 = vmax.f32 %v1267_v17, 0.0  ;;  %v1278_v35 = vadd.f32 %v2471_v32, %v3032_v13  ;;  %2492 = vmatprep.mubr.bf16.mxu0 %v2620_v33 }
 0x136   : > { %v1269_v37 = vpop.f32.mrf.mxu0  ;;  %2493 = vmatmul.mubr.bf16.gmra.mxu0 %v2622_v36  ;;  %1809 = vmatmul.mubr.bf16.gmra.mxu1 %v2621_v38 }
 0x137   : > { %1375 = vst [vmem:[#allocation2 + $0xb0] sm:$0xf] %v2290_v34  ;;  %v2288_v39 = vpack.c.bf16 %v1293_v18, %v1293_v18  ;;  %v1296_v40 = vmax.f32 %v1278_v35, 0.0  ;;  %v1270_v41 = vadd.f32 %v3032_v13, %v1269_v37  ;;  %1816 = vmatprep.mubr.bf16.mxu1 %v2623_v42 }
 0x139   : > { %1373 = vst [vmem:[#allocation2 + $0x98] sm:$0xf] %v2288_v39  ;;  %v2291_v43 = vpack.c.bf16 %v1296_v40, %v1296_v40  ;;  %v1294_v44 = vmax.f32 %v1270_v41, 0.0 }
 0x13a   : > { %v2627_v47 = vld [vmem:[#allocation2 + $0x80] ss:$12 sps:$4 sm:$0xff]  }
 0x13b   : > { %1376 = vst [vmem:[#allocation2 + $0xbc] sm:$0xf] %v2291_v43  ;;  %v2289_v45 = vpack.c.bf16 %v1294_v44, %v1294_v44 }
 0x13c   : > { %v2625_v46 = vld [vmem:[#allocation2 + $0x68] ss:$12 sps:$4 sm:$0xff]  }
 0x13d   : > { %1374 = vst [vmem:[#allocation2 + $0xa4] sm:$0xf] %v2289_v45  ;;  %2496 = vmatprep.mubr.bf16.mxu0 %v2625_v46 }
 0x13e   : > { %2497 = vmatmul.mubr.bf16.gmra.mxu0 %v2627_v47  ;;  %1817 = vmatmul.mubr.bf16.gmra.mxu1 %v2626_v48 }
 0x13f   : > { %1824 = vmatprep.mubr.bf16.mxu1 %v2628_v49 }
 0x142   : > { %v2632_v13 = vld [vmem:[#allocation2 + $0xb0] ss:$12 sps:$4 sm:$0xff]  }
 0x144   : > { %v2630_v50 = vld [vmem:[#allocation2 + $0x98] ss:$12 sps:$4 sm:$0xff]  }
 0x145   : > { %2500 = vmatprep.mubr.bf16.mxu0 %v2630_v50 }
 0x146   : > { %2501 = vmatmul.mubr.bf16.gmra.mxu0 %v2632_v13  ;;  %1825 = vmatmul.mubr.bf16.gmra.mxu1 %v2631_v51 }
 0x1ce   : > { %v2342_v52 = vpop.f32.mrf.mxu1 }
 0x1d0   : > { %v2343_v53 = vpop.f32.mrf.mxu1 }
 0x1d1   : > { %v2344_v3 = vadd.f32 %v2343_v53, %v2342_v52 }
 0x1d2   : > { %v2345_v54 = vpop.f32.mrf.mxu1 }
 0x1d3   : > { %v1771_v14 = vadd.f32 %v2344_v3, %v3056_v5 }
 0x1d4   : > { %v2346_v55 = vpop.f32.mrf.mxu1 }
 0x1d5   : > { %v2347_v10 = vadd.f32 %v2346_v55, %v2345_v54 }
 0x1d6   : > { %v2348_v56 = vpop.f32.mrf.mxu1 }
 0x1d7   : > { %v1774_v26 = vadd.f32 %v2347_v10, %v3056_v5 }
 0x1d8   : > { %v2349_v57 = vpop.f32.mrf.mxu1 }
 0x1d9   : > { %v2350_v1 = vadd.f32 %v2349_v57, %v2348_v56 }
 0x1da   : > { %v2351_v58 = vpop.f32.mrf.mxu1 }
 0x1db   : > { %v1779_v8 = vadd.f32 %v2350_v1, %v3056_v5 }
 0x1dc   : > { %v2352_v59 = vpop.f32.mrf.mxu1 }
 0x1dd   : > { %v2353_v6 = vadd.f32 %v2352_v59, %v2351_v58 }
 0x1de   : > { %v2354_v60 = vpop.f32.mrf.mxu1 }
 0x1df   : > { %v1782_v21 = vadd.f32 %v2353_v6, %v3056_v5 }
 0x1e0   : > { %v2355_v61 = vpop.f32.mrf.mxu1 }
 0x1e1   : > { %v2356_v23 = vadd.f32 %v2355_v61, %v2354_v60 }
 0x1e2   : > { %v2357_v62 = vpop.f32.mrf.mxu1 }
 0x1e3   : > { %v1787_v18 = vadd.f32 %v2356_v23, %v3056_v5 }
 0x1e4   : > { %v2358_v63 = vpop.f32.mrf.mxu1 }
 0x1e5   : > { %v2359_v32 = vadd.f32 %v2358_v63, %v2357_v62 }
 0x1e6   : > { %v2360_v0 = vpop.f32.mrf.mxu1 }
 0x1e7   : > { %v1790_v44 = vadd.f32 %v2359_v32, %v3056_v5 }
 0x1e8   : > { %v2361_v2 = vpop.f32.mrf.mxu1 }
 0x1e9   : > { %v2362_v16 = vadd.f32 %v2361_v2, %v2360_v0 }
 0x1ea   : > { %v2363_v4 = vpop.f32.mrf.mxu1 }
 0x1eb   : > { %v1795_v31 = vadd.f32 %v2362_v16, %v3056_v5 }
 0x1ec   : > { %v2364_v7 = vpop.f32.mrf.mxu1 }
 0x1ed   : > { %v2365_v28 = vadd.f32 %v2364_v7, %v2363_v4 }
 0x1ee   : > { %v2490_v9 = vpop.f32.mrf.mxu0  ;;  %v2366_v11 = vpop.f32.mrf.mxu1 }
 0x1ef   : > { %v1876_v12 = vadd.f32 %v2490_v9, %v1779_v8  ;;  %v1798_v38 = vadd.f32 %v2365_v28, %v3056_v5 }
 0x1f0   : > { %v1867_v15 = vpop.f32.mrf.mxu0  ;;  %v2367_v19 = vpop.f32.mrf.mxu1 }
 0x1f1   : > { %1932 = vst [vmem:[%s3060_s16 + $0x10] sm:$0xff] %v1876_v12  ;;  %v1868_v20 = vadd.f32 %v1867_v15, %v1771_v14  ;;  %v2368_v41 = vadd.f32 %v2367_v19, %v2366_v11 }
 0x1f2   : > { %v2491_v22 = vpop.f32.mrf.mxu0  ;;  %v2369_v24 = vpop.f32.mrf.mxu1 }
 0x1f3   : > { %1930 = vst [vmem:[%s3060_s16] sm:$0xff] %v1868_v20  ;;  %v1879_v25 = vadd.f32 %v2491_v22, %v1782_v21  ;;  %v1803_v53 = vadd.f32 %v2368_v41, %v3056_v5 }
 0x1f4   : > { %v1870_v27 = vpop.f32.mrf.mxu0  ;;  %v2370_v29 = vpop.f32.mrf.mxu1 }
 0x1f5   : > { %1933 = vst [vmem:[%s3060_s16 + $0x18] sm:$0xff] %v1879_v25  ;;  %v1871_v30 = vadd.f32 %v1870_v27, %v1774_v26  ;;  %v2371_v13 = vadd.f32 %v2370_v29, %v2369_v24 }
 0x1f6   : > { %v2494_v17 = vpop.f32.mrf.mxu0  ;;  %v2372_v33 = vpop.f32.mrf.mxu1 }
 0x1f7   : > { %1931 = vst [vmem:[%s3060_s16 + $0x8] sm:$0xff] %v1871_v30  ;;  %v1892_v34 = vadd.f32 %v2494_v17, %v1795_v31  ;;  %v1806_v62 = vadd.f32 %v2371_v13, %v3056_v5 }
 0x1f8   : > { %v1883_v35 = vpop.f32.mrf.mxu0  ;;  %v2373_v36 = vpop.f32.mrf.mxu1 }
 0x1f9   : > { %1936 = vst [vmem:[%s3060_s16 + $0x30] sm:$0xff] %v1892_v34  ;;  %v1884_v37 = vadd.f32 %v1883_v35, %v1787_v18  ;;  %v2374_v39 = vadd.f32 %v2373_v36, %v2372_v33 }
 0x1fa   : > { %v2495_v40 = vpop.f32.mrf.mxu0  ;;  %v2375_v42 = vpop.f32.mrf.mxu1 }
 0x1fb   : > { %1934 = vst [vmem:[%s3060_s16 + $0x20] sm:$0xff] %v1884_v37  ;;  %v1895_v43 = vadd.f32 %v2495_v40, %v1798_v38  ;;  %v1811_v48 = vadd.f32 %v2374_v39, %v3056_v5 }
 0x1fc   : > { %v1886_v45 = vpop.f32.mrf.mxu0  ;;  %v2376_v46 = vpop.f32.mrf.mxu1 }
 0x1fd   : > { %1937 = vst [vmem:[%s3060_s16 + $0x38] sm:$0xff] %v1895_v43  ;;  %v1887_v47 = vadd.f32 %v1886_v45, %v1790_v44  ;;  %v2377_v49 = vadd.f32 %v2376_v46, %v2375_v42 }
 0x1fe   : > { %v2498_v50 = vpop.f32.mrf.mxu0  ;;  %v2378_v51 = vpop.f32.mrf.mxu1 }
 0x1ff   : > { %1935 = vst [vmem:[%s3060_s16 + $0x28] sm:$0xff] %v1887_v47  ;;  %v1908_v52 = vadd.f32 %v2498_v50, %v1811_v48  ;;  %v1814_v57 = vadd.f32 %v2377_v49, %v3056_v5 }
 0x200   : > { %v1899_v54 = vpop.f32.mrf.mxu0  ;;  %v2379_v55 = vpop.f32.mrf.mxu1 }
 0x201   : > { %1940 = vst [vmem:[%s3060_s16 + $0x50] sm:$0xff] %v1908_v52  ;;  %v1900_v56 = vadd.f32 %v1899_v54, %v1803_v53  ;;  %v2380_v59 = vadd.f32 %v2379_v55, %v2378_v51 }
 0x202   : > { %v2499_v58 = vpop.f32.mrf.mxu0  ;;  %v2381_v60 = vpop.f32.mrf.mxu1 }
 0x203   : > { %1938 = vst [vmem:[%s3060_s16 + $0x40] sm:$0xff] %v1900_v56  ;;  %v1911_v61 = vadd.f32 %v2499_v58, %v1814_v57  ;;  %v1819_v6 = vadd.f32 %v2380_v59, %v3056_v5 }
 0x204   : > { %v1902_v63 = vpop.f32.mrf.mxu0  ;;  %v2382_v0 = vpop.f32.mrf.mxu1 }
 0x205   : > { %1941 = vst [vmem:[%s3060_s16 + $0x58] sm:$0xff] %v1911_v61  ;;  %v1903_v1 = vadd.f32 %v1902_v63, %v1806_v62  ;;  %v2383_v3 = vadd.f32 %v2382_v0, %v2381_v60 }
 0x206   : > { %v2502_v2 = vpop.f32.mrf.mxu0  ;;  %v2384_v4 = vpop.f32.mrf.mxu1 }
 0x207   : > { %1939 = vst [vmem:[%s3060_s16 + $0x48] sm:$0xff] %v1903_v1  ;;  %v1822_v14 = vadd.f32 %v2383_v3, %v3056_v5 }
 0x208   : > { %v1915_v7 = vpop.f32.mrf.mxu0  ;;  %v2385_v8 = vpop.f32.mrf.mxu1 }
 0x209   : > { %v1916_v9 = vadd.f32 %v1915_v7, %v1819_v6  ;;  %v2386_v10 = vadd.f32 %v2385_v8, %v2384_v4 }
 0x20a   : > { %v2503_v11 = vpop.f32.mrf.mxu0  ;;  %v2387_v12 = vpop.f32.mrf.mxu1 }
 0x20b   : > { %1942 = vst [vmem:[%s3060_s16 + $0x60] sm:$0xff] %v1916_v9  ;;  %v1827_v15 = vadd.f32 %v2386_v10, %v3056_v5 }
 0x20c   : > { %v1918_v16 = vpop.f32.mrf.mxu0  ;;  %v2388_v19 = vpop.f32.mrf.mxu1 }
 0x20d   : > { %v1919_v20 = vadd.f32 %v1918_v16, %v1822_v14  ;;  %v1924_v21 = vadd.f32 %v2502_v2, %v1827_v15  ;;  %v2389_v22 = vadd.f32 %v2388_v19, %v2387_v12 }
 0x20f   : > { %1943 = vst [vmem:[%s3060_s16 + $0x68] sm:$0xff] %v1919_v20  ;;  %1944 = vst [vmem:[%s3060_s16 + $0x70] sm:$0xff] %v1924_v21  ;;  %v1830_v23 = vadd.f32 %v2389_v22, %v3056_v5 }
 0x211   : > { %v1927_v24 = vadd.f32 %v2503_v11, %v1830_v23 }
 0x213   : > { %1945 = vst [vmem:[%s3060_s16 + $0x78] sm:$0xff] %v1927_v24 }
 0x214   : > { %2646 = shalt.err (!%p2643_p5)
}
 0x215   : > { %s2647_s9 = scalar_lea.hbm %s3097_s30, 2048  ;;  %s2651_s13 = scalar_lea.hbm %s3148_s5, 4096 }
 0x216   : > { %p2648_p7 = scmp.ne.s32.totalorder %s3097_s30, %s2647_s9  ;;  %p2652_p12 = scmp.lt.s32.totalorder %s3097_s30, %s3148_s5 }
 0x217   : > { %p2653_p13 = scmp.lt.s32.totalorder %s2651_s13, %s2647_s9 }
 0x218   : > { %p2649_p10 = pnand %p2648_p7, %p2766_p6 }
 0x219   : > { %p2654_p0 = por %p2653_p13, %p2652_p12 }
 0x21a   : > { %p2650_p11 = pneg %p2649_p10 }
 0x21c   : > { %p2655_p1 = pnand %p2654_p0, %p2650_p11 }
 0x21e   : > { %2658 = shalt.err (!%p2655_p1)
}
 0x21f   : > { %s2696_s17 = smov 128   ;;  %s2697_s25 = smov 8  }
 0x220   : > { %2506 = dma.vmem_to_hbm [thread:$0]  (%p2766_p6), %s3099_s23, 2048, %s3097_s30, %s1947_s10, %s2696_s17, %s2696_s17, %s2697_s25  }
 0x221 PF: > { %s1975_s26 = sand.u32 1, %s2681_s18   ;;  %p2509_p2 = pnand %p2030_p9, %p2770_p8 }
 0x222   : > { %s1976_s6 = scalar_lea.sflag [#allocation5], %s1975_s26 }
 0x223   : > { %p2510_p3 = pneg %p2509_p2 }
 0x225   : > { %2676 = dma.done.wait (%p2510_p3), %s1976_s6, 2048  }
 0x226   : > { %2678 = vsyncadd (%p2510_p3), %s1976_s6, 4294965248  ;;  %p15_p4 = scmp.ge.s32.totalorder %s2751_s24, 4   ;;  %s3151_s18 = smov %s2685_s19 }
 0x227   : > { %s3152_s19 = smov %s2689_s20  ;;  %s3153_s20 = smov %s2764_s27 }
 0x228   : > { %s3154_s21 = smov %s2751_s24  ;;  %17 = sbr.rel (!%p15_p4) target bundleno = 3 (0x3), region = 127 }
 0x22d   :  { %1981 = vsyncpa [#allocation5], 1 }
 0x22e   :  { %1983 = vsyncpa [#allocation5 + $0x1], 1 }

</bundles_post_ra>
